<compile_context>
chip_gen: v6e
topology: v6e:2x2x1
jax: 0.10.0
libtpu: 0.0.40
codegen_flags: <defaults>
</compile_context>

<pallas_src>
import functools

import jax
import jax.numpy as jnp
import numpy as np
from jax import lax
from jax.experimental import pallas as pl
from jax.experimental.pallas import tpu as pltpu

EPS = 1e-5
MATMUL_DTYPE = jnp.bfloat16   # MXU operand dtype (accumulation stays f32)


# --------------------------------- in-kernel helpers ------------------------------------
def _conv3x3_im2col(vpad_ref, patch_ref, mask_ref, w_mat, *, cin, H, W, L, pad):
    """3x3 stride-1 pad-1 conv as a single im2col matmul on the flat (cin, L) layout.

    vpad_ref : (CMAX, L + 2*pad) f32 scratch; rows [0:cin] hold the activation in flat
               NCHW order (L = N*H*W) with `pad` zeroed columns on each side.
    patch_ref: (9*CMAX, L) f32 scratch receiving the im2col matrix.
    mask_ref : (9, L) f32 input; mask_ref[t, q] == 1 iff tap t's source pixel for flat
               position q lies inside its image (kills row/column wrap at image edges).
    w_mat    : (Cout, 9*cin) bf16 weight matrix, columns ordered (kh, kw, cin).
    """
    for kh in range(3):
        for kw in range(3):
            t = kh * 3 + kw
            shift = (kh - 1) * W + (kw - 1)
            tap = vpad_ref[0:cin, pad + shift:pad + shift + L]          # (cin, L) f32
            if kh == 1 and kw == 1:                                      # center tap: always valid
                patch_ref[t * cin:(t + 1) * cin, :] = tap
            else:
                patch_ref[t * cin:(t + 1) * cin, :] = tap * mask_ref[t:t + 1, :]
    patches = patch_ref[0:9 * cin, :].astype(w_mat.dtype)               # single bf16 cast
    return jnp.dot(w_mat, patches, preferred_element_type=jnp.float32)  # (Cout, L) f32


def _batchnorm(y, gamma, beta):
    """Training-mode BatchNorm over the flat N*H*W axis (biased variance, eps=1e-5)."""
    mean = jnp.mean(y, axis=1, keepdims=True)                           # (C, 1)
    var = jnp.mean(jnp.square(y - mean), axis=1, keepdims=True)         # mean-subtracted
    scale = gamma * lax.rsqrt(var + EPS)
    return y * scale + (beta - mean * scale)


# ------------------------------------ fused kernel --------------------------------------
def _basic_block_kernel(x_ref, mask_ref, wf_ref, gf_ref, bf_ref, w2_ref, g2_ref, b2_ref,
                        out_ref, vpad_ref, patch_ref, *, N, H, W, Cin, C):
    HW = H * W
    L = N * HW
    pad = W + 1    # flat-axis halo: covers every tap shift in [-(W+1), W+1]

    # Zero only the two pad border strips (the interior is fully overwritten below).
    cmax = vpad_ref.shape[0]
    zeros_border = jnp.zeros((cmax, pad), vpad_ref.dtype)
    vpad_ref[:, 0:pad] = zeros_border
    vpad_ref[:, pad + L:pad + L + pad] = zeros_border

    # ------------- conv1 | downsample (fused along Cout) + BN -------------
    for n in range(N):                       # flatten the NCHW batch into the lane axis
        vpad_ref[0:Cin, pad + n * HW:pad + (n + 1) * HW] = x_ref[n]
    y1 = _conv3x3_im2col(vpad_ref, patch_ref, mask_ref, wf_ref[...],
                         cin=Cin, H=H, W=W, L=L, pad=pad)                # (2C, L) f32
    y1 = _batchnorm(y1, gf_ref[...], bf_ref[...])
    h = jnp.maximum(y1[0:C, :], 0.0)         # main branch: BN + ReLU
    residual = y1[C:2 * C, :]                # downsample branch: BN only

    # ------------- conv2 + BN (input `h` never leaves VMEM) -------------
    vpad_ref[0:C, pad:pad + L] = h
    y2 = _conv3x3_im2col(vpad_ref, patch_ref, mask_ref, w2_ref[...],
                         cin=C, H=H, W=W, L=L, pad=pad)                  # (C, L) f32
    y2 = _batchnorm(y2, g2_ref[...], b2_ref[...])

    out = jnp.maximum(y2 + residual, 0.0)    # residual add + final ReLU
    for n in range(N):
        out_ref[n] = out[:, n * HW:(n + 1) * HW]


# ----------------------------- parameter prep + forward pass ----------------------------
def _tap_masks(N, H, W):
    """(9, N*H*W) f32 0/1 masks: mask[t, q] == 1 iff tap t = kh*3+kw reads in-image."""
    q = np.arange(N * H * W)
    hh = (q // W) % H
    ww = q % W
    rows = []
    for kh in range(3):
        for kw in range(3):
            dh, dw = kh - 1, kw - 1
            rows.append((hh + dh >= 0) & (hh + dh < H) & (ww + dw >= 0) & (ww + dw < W))
    return jnp.asarray(np.stack(rows, axis=0), jnp.float32)


def _weight_to_mat(w_oihw):
    """PyTorch (Cout, Cin, 3, 3) -> (Cout, 9*Cin) bf16, columns ordered (kh, kw, cin)."""
    o, i, kh, kw = w_oihw.shape
    return jnp.transpose(w_oihw, (0, 2, 3, 1)).reshape(o, kh * kw * i).astype(MATMUL_DTYPE)


def prepare_params(w1, g1, b1, w2, g2, b2, w_ds, g_ds, b_ds):
    """Convert PyTorch-layout parameters into the fused kernel layout."""
    col = lambda v: v.reshape(-1, 1).astype(jnp.float32)
    return {
        # conv1 and downsample read the same x -> fuse them along Cout into one matmul.
        "w_f": jnp.concatenate([_weight_to_mat(w1), _weight_to_mat(w_ds)], axis=0),
        "g_f": jnp.concatenate([col(g1), col(g_ds)], axis=0),
        "b_f": jnp.concatenate([col(b1), col(b_ds)], axis=0),
        "w2": _weight_to_mat(w2),
        "g2": col(g2),
        "b2": col(b2),
    }


def basic_block_2d(x_nchw, params):
    """BasicBlock2D forward. Input/output are NCHW (matches PyTorch); reshapes are free."""
    N, Cin, H, W = x_nchw.shape
    C = params["g2"].shape[0]
    HW, L = H * W, N * H * W
    cmax = max(Cin, C)

    x = x_nchw.reshape(N, Cin, HW).astype(jnp.float32)   # flat NCHW, lane axis = H*W
    masks = _tap_masks(N, H, W)

    kernel = functools.partial(_basic_block_kernel, N=N, H=H, W=W, Cin=Cin, C=C)
    vmem = pl.BlockSpec(memory_space=pltpu.MemorySpace.VMEM)

    out = pl.pallas_call(
        kernel,
        out_shape=jax.ShapeDtypeStruct((N, C, HW), jnp.float32),
        in_specs=[vmem] * 8,
        out_specs=vmem,
        scratch_shapes=[
            pltpu.VMEM((cmax, L + 2 * (W + 1)), jnp.float32),   # flat padded activations
            pltpu.VMEM((9 * cmax, L), jnp.float32),             # im2col patch matrix
        ],
        # No grid: whole block (~0.4 MiB live) is VMEM-resident on every TPU generation,
        # so no dimension_semantics / vmem_limit tuning is needed.
    )(x, masks, params["w_f"], params["g_f"], params["b_f"],
      params["w2"], params["g2"], params["b2"])

    return out.reshape(N, C, H, W)


# ----------------------------- pure-JAX reference (checking) ----------------------------
def _ref_conv_bn(x_nchw, w_oihw, gamma, beta):
    y = lax.conv_general_dilated(
        x_nchw, w_oihw, window_strides=(1, 1), padding=((1, 1), (1, 1)),
        dimension_numbers=("NCHW", "OIHW", "NCHW"))
    mean = y.mean(axis=(0, 2, 3), keepdims=True)
    var = ((y - mean) ** 2).mean(axis=(0, 2, 3), keepdims=True)
    return (y - mean) * lax.rsqrt(var + EPS) * gamma.reshape(1, -1, 1, 1) \
        + beta.reshape(1, -1, 1, 1)


def _ref_block(x_nchw, p):
    res = _ref_conv_bn(x_nchw, p["w_ds"], p["g_ds"], p["b_ds"])
    h = jnp.maximum(_ref_conv_bn(x_nchw, p["w1"], p["g1"], p["b1"]), 0.0)
    out = _ref_conv_bn(h, p["w2"], p["g2"], p["b2"]) + res
    return jnp.maximum(out, 0.0)


if __name__ == "__main__":
    # Small shapes consistent with the module: N=2, Cin=4, Cout=8, H=W=16.
    N, Cin, C, H, W = 2, 4, 8, 16, 16

    key = jax.random.PRNGKey(0)
    kx, k1, k2, k3, kg1, kg2, kg3 = jax.random.split(key, 7)

    x = jax.random.normal(kx, (N, Cin, H, W), jnp.float32)
    w1 = jax.random.normal(k1, (C, Cin, 3, 3), jnp.float32) * 0.1
    w2 = jax.random.normal(k2, (C, C, 3, 3), jnp.float32) * 0.1
    wd = jax.random.normal(k3, (C, Cin, 3, 3), jnp.float32) * 0.1
    g1 = 1.0 + 0.1 * jax.random.normal(kg1, (C,), jnp.float32)
    g2 = 1.0 + 0.1 * jax.random.normal(kg2, (C,), jnp.float32)
    gd = 1.0 + 0.1 * jax.random.normal(kg3, (C,), jnp.float32)
    b1 = jnp.linspace(-0.1, 0.1, C, dtype=jnp.float32)
    b2 = jnp.linspace(0.1, -0.1, C, dtype=jnp.float32)
    bd = jnp.zeros((C,), jnp.float32)

    params = prepare_params(w1, g1, b1, w2, g2, b2, wd, gd, bd)

    fwd = jax.jit(basic_block_2d)
    out = jax.block_until_ready(fwd(x, params))

    torch_params = {"w1": w1, "g1": g1, "b1": b1, "w2": w2, "g2": g2, "b2": b2,
                    "w_ds": wd, "g_ds": gd, "b_ds": bd}
    ref = jax.block_until_ready(_ref_block(x, torch_params))

    assert out.shape == (N, C, H, W), out.shape
    # bf16 MXU operands perturb the result at the ~1e-3..1e-2 level vs. the pure-f32
    # reference; accumulation and all BN / residual math are f32.
    np.testing.assert_allclose(np.asarray(out), np.asarray(ref), atol=3e-2, rtol=3e-2)
    print("KERNEL_OK")
</pallas_src>

<mosaic_0001>
module attributes {stable_mosaic.version = 11 : i64} {
  func.func @_basic_block_kernel(%arg0: memref<2x4x256xf32, #tpu.memory_space<vmem>>, %arg1: memref<9x512xf32, #tpu.memory_space<vmem>>, %arg2: memref<16x36xbf16, #tpu.memory_space<vmem>>, %arg3: memref<16x1xf32, #tpu.memory_space<vmem>>, %arg4: memref<16x1xf32, #tpu.memory_space<vmem>>, %arg5: memref<8x72xbf16, #tpu.memory_space<vmem>>, %arg6: memref<8x1xf32, #tpu.memory_space<vmem>>, %arg7: memref<8x1xf32, #tpu.memory_space<vmem>>, %arg8: memref<2x8x256xf32, #tpu.memory_space<vmem>>, %arg9: memref<8x546xf32, #tpu.memory_space<vmem>>, %arg10: memref<72x512xf32, #tpu.memory_space<vmem>>) attributes {dimension_semantics = [], scalar_prefetch = 0 : i64, scratch_operands = 2 : i64, tpu.core_type = #tpu.core_type<tc>} {
    %cst = arith.constant 0.000000e+00 : f32
    %0 = vector.broadcast %cst : f32 to vector<8x17xf32>
    %c0 = arith.constant 0 : index
    %c0_0 = arith.constant 0 : index
    %1 = vector.load %arg9[%c0, %c0_0] : memref<8x546xf32, #tpu.memory_space<vmem>>, vector<8x17xf32>
    tpu.vector_store %arg9[%c0, %c0_0], %0 {strides = array<i32>} : memref<8x546xf32, #tpu.memory_space<vmem>>, vector<8x17xf32>,
    %c0_1 = arith.constant 0 : index
    %c529 = arith.constant 529 : index
    %2 = vector.load %arg9[%c0_1, %c529] : memref<8x546xf32, #tpu.memory_space<vmem>>, vector<8x17xf32>
    tpu.vector_store %arg9[%c0_1, %c529], %0 {strides = array<i32>} : memref<8x546xf32, #tpu.memory_space<vmem>>, vector<8x17xf32>,
    %c0_2 = arith.constant 0 : index
    %c0_3 = arith.constant 0 : index
    %c0_4 = arith.constant 0 : index
    %3 = vector.load %arg0[%c0_2, %c0_3, %c0_4] : memref<2x4x256xf32, #tpu.memory_space<vmem>>, vector<1x4x256xf32>
    %4 = vector.shape_cast %3 : vector<1x4x256xf32> to vector<4x256xf32>
    %c0_5 = arith.constant 0 : index
    %c17 = arith.constant 17 : index
    %5 = vector.load %arg9[%c0_5, %c17] : memref<8x546xf32, #tpu.memory_space<vmem>>, vector<4x256xf32>
    tpu.vector_store %arg9[%c0_5, %c17], %4 {strides = array<i32>} : memref<8x546xf32, #tpu.memory_space<vmem>>, vector<4x256xf32>,
    %c1 = arith.constant 1 : index
    %c0_6 = arith.constant 0 : index
    %c0_7 = arith.constant 0 : index
    %6 = vector.load %arg0[%c1, %c0_6, %c0_7] : memref<2x4x256xf32, #tpu.memory_space<vmem>>, vector<1x4x256xf32>
    %7 = vector.shape_cast %6 : vector<1x4x256xf32> to vector<4x256xf32>
    %c0_8 = arith.constant 0 : index
    %c273 = arith.constant 273 : index
    %8 = vector.load %arg9[%c0_8, %c273] : memref<8x546xf32, #tpu.memory_space<vmem>>, vector<4x256xf32>
    tpu.vector_store %arg9[%c0_8, %c273], %7 {strides = array<i32>} : memref<8x546xf32, #tpu.memory_space<vmem>>, vector<4x256xf32>,
    %c0_9 = arith.constant 0 : index
    %c0_10 = arith.constant 0 : index
    %9 = vector.load %arg2[%c0_9, %c0_10] : memref<16x36xbf16, #tpu.memory_space<vmem>>, vector<16x36xbf16>
    %c0_11 = arith.constant 0 : index
    %c0_12 = arith.constant 0 : index
    %10 = vector.load %arg9[%c0_11, %c0_12] : memref<8x546xf32, #tpu.memory_space<vmem>>, vector<4x512xf32>
    %c0_13 = arith.constant 0 : index
    %c0_14 = arith.constant 0 : index
    %11 = vector.load %arg1[%c0_13, %c0_14] : memref<9x512xf32, #tpu.memory_space<vmem>>, vector<1x512xf32>
    %12 = vector.broadcast %11 : vector<1x512xf32> to vector<4x512xf32>
    %13 = arith.mulf %10, %12 : vector<4x512xf32>
    %c0_15 = arith.constant 0 : index
    %c0_16 = arith.constant 0 : index
    %14 = vector.load %arg10[%c0_15, %c0_16] : memref<72x512xf32, #tpu.memory_space<vmem>>, vector<4x512xf32>
    tpu.vector_store %arg10[%c0_15, %c0_16], %13 {strides = array<i32>} : memref<72x512xf32, #tpu.memory_space<vmem>>, vector<4x512xf32>,
    %c0_17 = arith.constant 0 : index
    %c1_18 = arith.constant 1 : index
    %15 = vector.load %arg9[%c0_17, %c1_18] : memref<8x546xf32, #tpu.memory_space<vmem>>, vector<4x512xf32>
    %c1_19 = arith.constant 1 : index
    %c0_20 = arith.constant 0 : index
    %16 = vector.load %arg1[%c1_19, %c0_20] : memref<9x512xf32, #tpu.memory_space<vmem>>, vector<1x512xf32>
    %17 = vector.broadcast %16 : vector<1x512xf32> to vector<4x512xf32>
    %18 = arith.mulf %15, %17 : vector<4x512xf32>
    %c4 = arith.constant 4 : index
    %c0_21 = arith.constant 0 : index
    %19 = vector.load %arg10[%c4, %c0_21] : memref<72x512xf32, #tpu.memory_space<vmem>>, vector<4x512xf32>
    tpu.vector_store %arg10[%c4, %c0_21], %18 {strides = array<i32>} : memref<72x512xf32, #tpu.memory_space<vmem>>, vector<4x512xf32>,
    %c0_22 = arith.constant 0 : index
    %c2 = arith.constant 2 : index
    %20 = vector.load %arg9[%c0_22, %c2] : memref<8x546xf32, #tpu.memory_space<vmem>>, vector<4x512xf32>
    %c2_23 = arith.constant 2 : index
    %c0_24 = arith.constant 0 : index
    %21 = vector.load %arg1[%c2_23, %c0_24] : memref<9x512xf32, #tpu.memory_space<vmem>>, vector<1x512xf32>
    %22 = vector.broadcast %21 : vector<1x512xf32> to vector<4x512xf32>
    %23 = arith.mulf %20, %22 : vector<4x512xf32>
    %c8 = arith.constant 8 : index
    %c0_25 = arith.constant 0 : index
    %24 = vector.load %arg10[%c8, %c0_25] : memref<72x512xf32, #tpu.memory_space<vmem>>, vector<4x512xf32>
    tpu.vector_store %arg10[%c8, %c0_25], %23 {strides = array<i32>} : memref<72x512xf32, #tpu.memory_space<vmem>>, vector<4x512xf32>,
    %c0_26 = arith.constant 0 : index
    %c16 = arith.constant 16 : index
    %25 = vector.load %arg9[%c0_26, %c16] : memref<8x546xf32, #tpu.memory_space<vmem>>, vector<4x512xf32>
    %c3 = arith.constant 3 : index
    %c0_27 = arith.constant 0 : index
    %26 = vector.load %arg1[%c3, %c0_27] : memref<9x512xf32, #tpu.memory_space<vmem>>, vector<1x512xf32>
    %27 = vector.broadcast %26 : vector<1x512xf32> to vector<4x512xf32>
    %28 = arith.mulf %25, %27 : vector<4x512xf32>
    %c12 = arith.constant 12 : index
    %c0_28 = arith.constant 0 : index
    %29 = vector.load %arg10[%c12, %c0_28] : memref<72x512xf32, #tpu.memory_space<vmem>>, vector<4x512xf32>
    tpu.vector_store %arg10[%c12, %c0_28], %28 {strides = array<i32>} : memref<72x512xf32, #tpu.memory_space<vmem>>, vector<4x512xf32>,
    %c0_29 = arith.constant 0 : index
    %c17_30 = arith.constant 17 : index
    %30 = vector.load %arg9[%c0_29, %c17_30] : memref<8x546xf32, #tpu.memory_space<vmem>>, vector<4x512xf32>
    %c16_31 = arith.constant 16 : index
    %c0_32 = arith.constant 0 : index
    %31 = vector.load %arg10[%c16_31, %c0_32] : memref<72x512xf32, #tpu.memory_space<vmem>>, vector<4x512xf32>
    tpu.vector_store %arg10[%c16_31, %c0_32], %30 {strides = array<i32>} : memref<72x512xf32, #tpu.memory_space<vmem>>, vector<4x512xf32>,
    %c0_33 = arith.constant 0 : index
    %c18 = arith.constant 18 : index
    %32 = vector.load %arg9[%c0_33, %c18] : memref<8x546xf32, #tpu.memory_space<vmem>>, vector<4x512xf32>
    %c5 = arith.constant 5 : index
    %c0_34 = arith.constant 0 : index
    %33 = vector.load %arg1[%c5, %c0_34] : memref<9x512xf32, #tpu.memory_space<vmem>>, vector<1x512xf32>
    %34 = vector.broadcast %33 : vector<1x512xf32> to vector<4x512xf32>
    %35 = arith.mulf %32, %34 : vector<4x512xf32>
    %c20 = arith.constant 20 : index
    %c0_35 = arith.constant 0 : index
    %36 = vector.load %arg10[%c20, %c0_35] : memref<72x512xf32, #tpu.memory_space<vmem>>, vector<4x512xf32>
    tpu.vector_store %arg10[%c20, %c0_35], %35 {strides = array<i32>} : memref<72x512xf32, #tpu.memory_space<vmem>>, vector<4x512xf32>,
    %c0_36 = arith.constant 0 : index
    %c32 = arith.constant 32 : index
    %37 = vector.load %arg9[%c0_36, %c32] : memref<8x546xf32, #tpu.memory_space<vmem>>, vector<4x512xf32>
    %c6 = arith.constant 6 : index
    %c0_37 = arith.constant 0 : index
    %38 = vector.load %arg1[%c6, %c0_37] : memref<9x512xf32, #tpu.memory_space<vmem>>, vector<1x512xf32>
    %39 = vector.broadcast %38 : vector<1x512xf32> to vector<4x512xf32>
    %40 = arith.mulf %37, %39 : vector<4x512xf32>
    %c24 = arith.constant 24 : index
    %c0_38 = arith.constant 0 : index
    %41 = vector.load %arg10[%c24, %c0_38] : memref<72x512xf32, #tpu.memory_space<vmem>>, vector<4x512xf32>
    tpu.vector_store %arg10[%c24, %c0_38], %40 {strides = array<i32>} : memref<72x512xf32, #tpu.memory_space<vmem>>, vector<4x512xf32>,
    %c0_39 = arith.constant 0 : index
    %c33 = arith.constant 33 : index
    %42 = vector.load %arg9[%c0_39, %c33] : memref<8x546xf32, #tpu.memory_space<vmem>>, vector<4x512xf32>
    %c7 = arith.constant 7 : index
    %c0_40 = arith.constant 0 : index
    %43 = vector.load %arg1[%c7, %c0_40] : memref<9x512xf32, #tpu.memory_space<vmem>>, vector<1x512xf32>
    %44 = vector.broadcast %43 : vector<1x512xf32> to vector<4x512xf32>
    %45 = arith.mulf %42, %44 : vector<4x512xf32>
    %c28 = arith.constant 28 : index
    %c0_41 = arith.constant 0 : index
    %46 = vector.load %arg10[%c28, %c0_41] : memref<72x512xf32, #tpu.memory_space<vmem>>, vector<4x512xf32>
    tpu.vector_store %arg10[%c28, %c0_41], %45 {strides = array<i32>} : memref<72x512xf32, #tpu.memory_space<vmem>>, vector<4x512xf32>,
    %c0_42 = arith.constant 0 : index
    %c34 = arith.constant 34 : index
    %47 = vector.load %arg9[%c0_42, %c34] : memref<8x546xf32, #tpu.memory_space<vmem>>, vector<4x512xf32>
    %c8_43 = arith.constant 8 : index
    %c0_44 = arith.constant 0 : index
    %48 = vector.load %arg1[%c8_43, %c0_44] : memref<9x512xf32, #tpu.memory_space<vmem>>, vector<1x512xf32>
    %49 = vector.broadcast %48 : vector<1x512xf32> to vector<4x512xf32>
    %50 = arith.mulf %47, %49 : vector<4x512xf32>
    %c32_45 = arith.constant 32 : index
    %c0_46 = arith.constant 0 : index
    %51 = vector.load %arg10[%c32_45, %c0_46] : memref<72x512xf32, #tpu.memory_space<vmem>>, vector<4x512xf32>
    tpu.vector_store %arg10[%c32_45, %c0_46], %50 {strides = array<i32>} : memref<72x512xf32, #tpu.memory_space<vmem>>, vector<4x512xf32>,
    %c0_47 = arith.constant 0 : index
    %c0_48 = arith.constant 0 : index
    %52 = vector.load %arg10[%c0_47, %c0_48] : memref<72x512xf32, #tpu.memory_space<vmem>>, vector<36x512xf32>
    %53 = arith.truncf %52 : vector<36x512xf32> to vector<36x512xbf16>
    %cst_49 = arith.constant dense<0.000000e+00> : vector<16x512xf32>
    %54 = tpu.matmul %9, %53, %cst_49 {dimension_numbers = #tpu.dot_dimension_numbers<[1], [0], [0], [1], [0, 0, 1, 1], [], []>} : vector<16x36xbf16>, vector<36x512xbf16>, vector<16x512xf32> -> vector<16x512xf32>
    %c0_50 = arith.constant 0 : index
    %c0_51 = arith.constant 0 : index
    %55 = vector.load %arg3[%c0_50, %c0_51] : memref<16x1xf32, #tpu.memory_space<vmem>>, vector<16x1xf32>
    %c0_52 = arith.constant 0 : index
    %c0_53 = arith.constant 0 : index
    %56 = vector.load %arg4[%c0_52, %c0_53] : memref<16x1xf32, #tpu.memory_space<vmem>>, vector<16x1xf32>
    %cst_54 = arith.constant dense<0.000000e+00> : vector<16xf32>
    %57 = vector.multi_reduction <add>, %54, %cst_54 [1] : vector<16x512xf32> to vector<16xf32>
    %58 = vector.shape_cast %57 : vector<16xf32> to vector<16x1xf32>
    %cst_55 = arith.constant 5.120000e+02 : f32
    %59 = vector.broadcast %cst_55 : f32 to vector<16x1xf32>
    %60 = arith.divf %58, %59 : vector<16x1xf32>
    %61 = vector.broadcast %60 : vector<16x1xf32> to vector<16x512xf32>
    %62 = arith.subf %54, %61 : vector<16x512xf32>
    %63 = arith.mulf %62, %62 : vector<16x512xf32>
    %cst_56 = arith.constant dense<0.000000e+00> : vector<16xf32>
    %64 = vector.multi_reduction <add>, %63, %cst_56 [1] : vector<16x512xf32> to vector<16xf32>
    %65 = vector.shape_cast %64 : vector<16xf32> to vector<16x1xf32>
    %cst_57 = arith.constant 5.120000e+02 : f32
    %66 = vector.broadcast %cst_57 : f32 to vector<16x1xf32>
    %67 = arith.divf %65, %66 : vector<16x1xf32>
    %cst_58 = arith.constant 9.99999974E-6 : f32
    %68 = vector.broadcast %cst_58 : f32 to vector<16x1xf32>
    %69 = arith.addf %67, %68 : vector<16x1xf32>
    %70 = math.rsqrt %69 : vector<16x1xf32>
    %71 = arith.mulf %55, %70 : vector<16x1xf32>
    %72 = vector.broadcast %71 : vector<16x1xf32> to vector<16x512xf32>
    %73 = arith.mulf %54, %72 : vector<16x512xf32>
    %74 = arith.mulf %60, %71 : vector<16x1xf32>
    %75 = arith.subf %56, %74 : vector<16x1xf32>
    %76 = vector.broadcast %75 : vector<16x1xf32> to vector<16x512xf32>
    %77 = arith.addf %73, %76 : vector<16x512xf32>
    %78 = vector.extract_strided_slice %77 {offsets = [0, 0], sizes = [8, 512], strides = [1, 1]} : vector<16x512xf32> to vector<8x512xf32>
    %cst_59 = arith.constant 0.000000e+00 : f32
    %79 = vector.broadcast %cst_59 : f32 to vector<8x512xf32>
    %80 = arith.maximumf %78, %79 : vector<8x512xf32>
    %81 = vector.extract_strided_slice %77 {offsets = [8, 0], sizes = [8, 512], strides = [1, 1]} : vector<16x512xf32> to vector<8x512xf32>
    %c0_60 = arith.constant 0 : index
    %c17_61 = arith.constant 17 : index
    %82 = vector.load %arg9[%c0_60, %c17_61] : memref<8x546xf32, #tpu.memory_space<vmem>>, vector<8x512xf32>
    tpu.vector_store %arg9[%c0_60, %c17_61], %80 {strides = array<i32>} : memref<8x546xf32, #tpu.memory_space<vmem>>, vector<8x512xf32>,
    %c0_62 = arith.constant 0 : index
    %c0_63 = arith.constant 0 : index
    %83 = vector.load %arg5[%c0_62, %c0_63] : memref<8x72xbf16, #tpu.memory_space<vmem>>, vector<8x72xbf16>
    %c0_64 = arith.constant 0 : index
    %c0_65 = arith.constant 0 : index
    %84 = vector.load %arg9[%c0_64, %c0_65] : memref<8x546xf32, #tpu.memory_space<vmem>>, vector<8x512xf32>
    %c0_66 = arith.constant 0 : index
    %c0_67 = arith.constant 0 : index
    %85 = vector.load %arg1[%c0_66, %c0_67] : memref<9x512xf32, #tpu.memory_space<vmem>>, vector<1x512xf32>
    %86 = vector.broadcast %85 : vector<1x512xf32> to vector<8x512xf32>
    %87 = arith.mulf %84, %86 : vector<8x512xf32>
    %c0_68 = arith.constant 0 : index
    %c0_69 = arith.constant 0 : index
    %88 = vector.load %arg10[%c0_68, %c0_69] : memref<72x512xf32, #tpu.memory_space<vmem>>, vector<8x512xf32>
    tpu.vector_store %arg10[%c0_68, %c0_69], %87 {strides = array<i32>} : memref<72x512xf32, #tpu.memory_space<vmem>>, vector<8x512xf32>,
    %c0_70 = arith.constant 0 : index
    %c1_71 = arith.constant 1 : index
    %89 = vector.load %arg9[%c0_70, %c1_71] : memref<8x546xf32, #tpu.memory_space<vmem>>, vector<8x512xf32>
    %c1_72 = arith.constant 1 : index
    %c0_73 = arith.constant 0 : index
    %90 = vector.load %arg1[%c1_72, %c0_73] : memref<9x512xf32, #tpu.memory_space<vmem>>, vector<1x512xf32>
    %91 = vector.broadcast %90 : vector<1x512xf32> to vector<8x512xf32>
    %92 = arith.mulf %89, %91 : vector<8x512xf32>
    %c8_74 = arith.constant 8 : index
    %c0_75 = arith.constant 0 : index
    %93 = vector.load %arg10[%c8_74, %c0_75] : memref<72x512xf32, #tpu.memory_space<vmem>>, vector<8x512xf32>
    tpu.vector_store %arg10[%c8_74, %c0_75], %92 {strides = array<i32>} : memref<72x512xf32, #tpu.memory_space<vmem>>, vector<8x512xf32>,
    %c0_76 = arith.constant 0 : index
    %c2_77 = arith.constant 2 : index
    %94 = vector.load %arg9[%c0_76, %c2_77] : memref<8x546xf32, #tpu.memory_space<vmem>>, vector<8x512xf32>
    %c2_78 = arith.constant 2 : index
    %c0_79 = arith.constant 0 : index
    %95 = vector.load %arg1[%c2_78, %c0_79] : memref<9x512xf32, #tpu.memory_space<vmem>>, vector<1x512xf32>
    %96 = vector.broadcast %95 : vector<1x512xf32> to vector<8x512xf32>
    %97 = arith.mulf %94, %96 : vector<8x512xf32>
    %c16_80 = arith.constant 16 : index
    %c0_81 = arith.constant 0 : index
    %98 = vector.load %arg10[%c16_80, %c0_81] : memref<72x512xf32, #tpu.memory_space<vmem>>, vector<8x512xf32>
    tpu.vector_store %arg10[%c16_80, %c0_81], %97 {strides = array<i32>} : memref<72x512xf32, #tpu.memory_space<vmem>>, vector<8x512xf32>,
    %c0_82 = arith.constant 0 : index
    %c16_83 = arith.constant 16 : index
    %99 = vector.load %arg9[%c0_82, %c16_83] : memref<8x546xf32, #tpu.memory_space<vmem>>, vector<8x512xf32>
    %c3_84 = arith.constant 3 : index
    %c0_85 = arith.constant 0 : index
    %100 = vector.load %arg1[%c3_84, %c0_85] : memref<9x512xf32, #tpu.memory_space<vmem>>, vector<1x512xf32>
    %101 = vector.broadcast %100 : vector<1x512xf32> to vector<8x512xf32>
    %102 = arith.mulf %99, %101 : vector<8x512xf32>
    %c24_86 = arith.constant 24 : index
    %c0_87 = arith.constant 0 : index
    %103 = vector.load %arg10[%c24_86, %c0_87] : memref<72x512xf32, #tpu.memory_space<vmem>>, vector<8x512xf32>
    tpu.vector_store %arg10[%c24_86, %c0_87], %102 {strides = array<i32>} : memref<72x512xf32, #tpu.memory_space<vmem>>, vector<8x512xf32>,
    %c0_88 = arith.constant 0 : index
    %c17_89 = arith.constant 17 : index
    %104 = vector.load %arg9[%c0_88, %c17_89] : memref<8x546xf32, #tpu.memory_space<vmem>>, vector<8x512xf32>
    %c32_90 = arith.constant 32 : index
    %c0_91 = arith.constant 0 : index
    %105 = vector.load %arg10[%c32_90, %c0_91] : memref<72x512xf32, #tpu.memory_space<vmem>>, vector<8x512xf32>
    tpu.vector_store %arg10[%c32_90, %c0_91], %104 {strides = array<i32>} : memref<72x512xf32, #tpu.memory_space<vmem>>, vector<8x512xf32>,
    %c0_92 = arith.constant 0 : index
    %c18_93 = arith.constant 18 : index
    %106 = vector.load %arg9[%c0_92, %c18_93] : memref<8x546xf32, #tpu.memory_space<vmem>>, vector<8x512xf32>
    %c5_94 = arith.constant 5 : index
    %c0_95 = arith.constant 0 : index
    %107 = vector.load %arg1[%c5_94, %c0_95] : memref<9x512xf32, #tpu.memory_space<vmem>>, vector<1x512xf32>
    %108 = vector.broadcast %107 : vector<1x512xf32> to vector<8x512xf32>
    %109 = arith.mulf %106, %108 : vector<8x512xf32>
    %c40 = arith.constant 40 : index
    %c0_96 = arith.constant 0 : index
    %110 = vector.load %arg10[%c40, %c0_96] : memref<72x512xf32, #tpu.memory_space<vmem>>, vector<8x512xf32>
    tpu.vector_store %arg10[%c40, %c0_96], %109 {strides = array<i32>} : memref<72x512xf32, #tpu.memory_space<vmem>>, vector<8x512xf32>,
    %c0_97 = arith.constant 0 : index
    %c32_98 = arith.constant 32 : index
    %111 = vector.load %arg9[%c0_97, %c32_98] : memref<8x546xf32, #tpu.memory_space<vmem>>, vector<8x512xf32>
    %c6_99 = arith.constant 6 : index
    %c0_100 = arith.constant 0 : index
    %112 = vector.load %arg1[%c6_99, %c0_100] : memref<9x512xf32, #tpu.memory_space<vmem>>, vector<1x512xf32>
    %113 = vector.broadcast %112 : vector<1x512xf32> to vector<8x512xf32>
    %114 = arith.mulf %111, %113 : vector<8x512xf32>
    %c48 = arith.constant 48 : index
    %c0_101 = arith.constant 0 : index
    %115 = vector.load %arg10[%c48, %c0_101] : memref<72x512xf32, #tpu.memory_space<vmem>>, vector<8x512xf32>
    tpu.vector_store %arg10[%c48, %c0_101], %114 {strides = array<i32>} : memref<72x512xf32, #tpu.memory_space<vmem>>, vector<8x512xf32>,
    %c0_102 = arith.constant 0 : index
    %c33_103 = arith.constant 33 : index
    %116 = vector.load %arg9[%c0_102, %c33_103] : memref<8x546xf32, #tpu.memory_space<vmem>>, vector<8x512xf32>
    %c7_104 = arith.constant 7 : index
    %c0_105 = arith.constant 0 : index
    %117 = vector.load %arg1[%c7_104, %c0_105] : memref<9x512xf32, #tpu.memory_space<vmem>>, vector<1x512xf32>
    %118 = vector.broadcast %117 : vector<1x512xf32> to vector<8x512xf32>
    %119 = arith.mulf %116, %118 : vector<8x512xf32>
    %c56 = arith.constant 56 : index
    %c0_106 = arith.constant 0 : index
    %120 = vector.load %arg10[%c56, %c0_106] : memref<72x512xf32, #tpu.memory_space<vmem>>, vector<8x512xf32>
    tpu.vector_store %arg10[%c56, %c0_106], %119 {strides = array<i32>} : memref<72x512xf32, #tpu.memory_space<vmem>>, vector<8x512xf32>,
    %c0_107 = arith.constant 0 : index
    %c34_108 = arith.constant 34 : index
    %121 = vector.load %arg9[%c0_107, %c34_108] : memref<8x546xf32, #tpu.memory_space<vmem>>, vector<8x512xf32>
    %c8_109 = arith.constant 8 : index
    %c0_110 = arith.constant 0 : index
    %122 = vector.load %arg1[%c8_109, %c0_110] : memref<9x512xf32, #tpu.memory_space<vmem>>, vector<1x512xf32>
    %123 = vector.broadcast %122 : vector<1x512xf32> to vector<8x512xf32>
    %124 = arith.mulf %121, %123 : vector<8x512xf32>
    %c64 = arith.constant 64 : index
    %c0_111 = arith.constant 0 : index
    %125 = vector.load %arg10[%c64, %c0_111] : memref<72x512xf32, #tpu.memory_space<vmem>>, vector<8x512xf32>
    tpu.vector_store %arg10[%c64, %c0_111], %124 {strides = array<i32>} : memref<72x512xf32, #tpu.memory_space<vmem>>, vector<8x512xf32>,
    %c0_112 = arith.constant 0 : index
    %c0_113 = arith.constant 0 : index
    %126 = vector.load %arg10[%c0_112, %c0_113] : memref<72x512xf32, #tpu.memory_space<vmem>>, vector<72x512xf32>
    %127 = arith.truncf %126 : vector<72x512xf32> to vector<72x512xbf16>
    %cst_114 = arith.constant dense<0.000000e+00> : vector<8x512xf32>
    %128 = tpu.matmul %83, %127, %cst_114 {dimension_numbers = #tpu.dot_dimension_numbers<[1], [0], [0], [1], [0, 0, 1, 1], [], []>} : vector<8x72xbf16>, vector<72x512xbf16>, vector<8x512xf32> -> vector<8x512xf32>
    %c0_115 = arith.constant 0 : index
    %c0_116 = arith.constant 0 : index
    %129 = vector.load %arg6[%c0_115, %c0_116] : memref<8x1xf32, #tpu.memory_space<vmem>>, vector<8x1xf32>
    %c0_117 = arith.constant 0 : index
    %c0_118 = arith.constant 0 : index
    %130 = vector.load %arg7[%c0_117, %c0_118] : memref<8x1xf32, #tpu.memory_space<vmem>>, vector<8x1xf32>
    %cst_119 = arith.constant dense<0.000000e+00> : vector<8xf32>
    %131 = vector.multi_reduction <add>, %128, %cst_119 [1] : vector<8x512xf32> to vector<8xf32>
    %132 = vector.shape_cast %131 : vector<8xf32> to vector<8x1xf32>
    %cst_120 = arith.constant 5.120000e+02 : f32
    %133 = vector.broadcast %cst_120 : f32 to vector<8x1xf32>
    %134 = arith.divf %132, %133 : vector<8x1xf32>
    %135 = vector.broadcast %134 : vector<8x1xf32> to vector<8x512xf32>
    %136 = arith.subf %128, %135 : vector<8x512xf32>
    %137 = arith.mulf %136, %136 : vector<8x512xf32>
    %cst_121 = arith.constant dense<0.000000e+00> : vector<8xf32>
    %138 = vector.multi_reduction <add>, %137, %cst_121 [1] : vector<8x512xf32> to vector<8xf32>
    %139 = vector.shape_cast %138 : vector<8xf32> to vector<8x1xf32>
    %cst_122 = arith.constant 5.120000e+02 : f32
    %140 = vector.broadcast %cst_122 : f32 to vector<8x1xf32>
    %141 = arith.divf %139, %140 : vector<8x1xf32>
    %cst_123 = arith.constant 9.99999974E-6 : f32
    %142 = vector.broadcast %cst_123 : f32 to vector<8x1xf32>
    %143 = arith.addf %141, %142 : vector<8x1xf32>
    %144 = math.rsqrt %143 : vector<8x1xf32>
    %145 = arith.mulf %129, %144 : vector<8x1xf32>
    %146 = vector.broadcast %145 : vector<8x1xf32> to vector<8x512xf32>
    %147 = arith.mulf %128, %146 : vector<8x512xf32>
    %148 = arith.mulf %134, %145 : vector<8x1xf32>
    %149 = arith.subf %130, %148 : vector<8x1xf32>
    %150 = vector.broadcast %149 : vector<8x1xf32> to vector<8x512xf32>
    %151 = arith.addf %147, %150 : vector<8x512xf32>
    %152 = arith.addf %151, %81 : vector<8x512xf32>
    %cst_124 = arith.constant 0.000000e+00 : f32
    %153 = vector.broadcast %cst_124 : f32 to vector<8x512xf32>
    %154 = arith.maximumf %152, %153 : vector<8x512xf32>
    %155 = vector.extract_strided_slice %154 {offsets = [0, 0], sizes = [8, 256], strides = [1, 1]} : vector<8x512xf32> to vector<8x256xf32>
    %c0_125 = arith.constant 0 : index
    %c0_126 = arith.constant 0 : index
    %c0_127 = arith.constant 0 : index
    %156 = vector.load %arg8[%c0_125, %c0_126, %c0_127] : memref<2x8x256xf32, #tpu.memory_space<vmem>>, vector<1x8x256xf32>
    %157 = vector.shape_cast %156 : vector<1x8x256xf32> to vector<8x256xf32>
    %158 = vector.shape_cast %155 : vector<8x256xf32> to vector<1x8x256xf32>
    tpu.vector_store %arg8[%c0_125, %c0_126, %c0_127], %158 {strides = array<i32>} : memref<2x8x256xf32, #tpu.memory_space<vmem>>, vector<1x8x256xf32>,
    %159 = vector.extract_strided_slice %154 {offsets = [0, 256], sizes = [8, 256], strides = [1, 1]} : vector<8x512xf32> to vector<8x256xf32>
    %c1_128 = arith.constant 1 : index
    %c0_129 = arith.constant 0 : index
    %c0_130 = arith.constant 0 : index
    %160 = vector.load %arg8[%c1_128, %c0_129, %c0_130] : memref<2x8x256xf32, #tpu.memory_space<vmem>>, vector<1x8x256xf32>
    %161 = vector.shape_cast %160 : vector<1x8x256xf32> to vector<8x256xf32>
    %162 = vector.shape_cast %159 : vector<8x256xf32> to vector<1x8x256xf32>
    tpu.vector_store %arg8[%c1_128, %c0_129, %c0_130], %162 {strides = array<i32>} : memref<2x8x256xf32, #tpu.memory_space<vmem>>, vector<1x8x256xf32>,
    return
  }
}

</mosaic_0001>

<bundles_post_ra>
// kernel: basic_block_2d.1
= control target key start
LH: loop header
LB: loop body
LE: loop exit
PB: predicated region body
PF: predicated region fallthrough
CT: control target
= control target key end

     0   :  { %v73_v0 = vlaneseq  ;;  %vm30_vm0 = vcmask 138240   ;;  %v1769_v3 = vmov 0.0   ;;  %s1770_s9 = smov 17   ;;  %vm32_vm1 = vcmask 277640   ;;  %s1771_s13 = smov 34   ;;  %s2616_s0 = inlined_call_operand.vmem [shape: f32[2,4,256], index: 0, kind: input, shape index: {}]   ;;  %s2617_s1 = inlined_call_operand.vmem [shape: f32[9,512], index: 1, kind: input, shape index: {}]   ;;  %s2618_s2 = inlined_call_operand.vmem [shape: bf16[16,36], index: 2, kind: input, shape index: {}]   ;;  %s2619_s3 = inlined_call_operand.vmem [shape: f32[16,1], index: 3, kind: input, shape index: {}]   ;;  %s2620_s4 = inlined_call_operand.vmem [shape: f32[16,1], index: 4, kind: input, shape index: {}]   ;;  %s2621_s5 = inlined_call_operand.vmem [shape: bf16[8,72], index: 5, kind: input, shape index: {}]   ;;  %s2622_s6 = inlined_call_operand.vmem [shape: f32[8,1], index: 6, kind: input, shape index: {}]   ;;  %s2623_s7 = inlined_call_operand.vmem [shape: f32[8,1], index: 7, kind: input, shape index: {}]   ;;  %s2624_s8 = inlined_call_operand.vmem [shape: f32[2,8,256], index: 8, kind: output, shape index: {}]  }
   0x1   :  { %v1714_v1 = vld [vmem:[%s2616_s0 + $0x8] sm:$0xff]  ;;  %v34_v2 = vld [vmem:[%s2616_s0] sm:$0xff]  ;;  %31 = vst.msk [vmem:[#allocation2] sm:$0xff] %vm30_vm0, %v1769_v3  ;;  %s1772_s14 = smov 18   ;;  %s1773_s19 = smov 33   ;;  %vm45_vm2 = vcmask 1043592  }
   0x2   :  { %54 = vrot.lane.b32.xlu1 %v1714_v1, %s1770_s9  ;;  %v53_v4 = vcombine.high %v1714_v1, %v1714_v1  ;;  %37 = vrot.lane.b32.xlu0 %v34_v2, %s1770_s9  ;;  %v36_v5 = vcombine.high %v34_v2, %v34_v2  ;;  %v74_v6 = vshrl.u32 %v73_v0, 7  ;;  %v1721_v7 = vld [vmem:[%s2617_s1 + $0x20] ss:$8 sm:$0xf]  ;;  %33 = vst.msk [vmem:[#allocation2 + $0x20] sm:$0xff] %vm32_vm1, %v1769_v3  ;;  %s1774_s20 = smov 32  }
   0x3   :  { %v1718_v13 = vld [vmem:[%s2617_s1 + $0x5] ss:$8 sm:$0xf]  ;;  %v1720_v18 = vld [vmem:[%s2617_s1 + $0x7] ss:$8 sm:$0xf] }
   0x4   :  { %v1844_v8 = vsub.s32 1, %v74_v6  ;;  %v1846_v9 = vsub.s32 0, %v74_v6  ;;  %v1852_v12 = vsub.s32 2, %v74_v6  ;;  %v1719_v21 = vld [vmem:[%s2617_s1 + $0x6] ss:$8 sm:$0xf] }
   0x5   :  { %v1883_v26 = vsub.s32 3, %v74_v6  ;;  %v1715_v27 = vld [vmem:[%s2617_s1 + $0x1] ss:$8 sm:$0xf]  ;;  %s1775_s23 = smov 1   ;;  %s1776_s26 = smov 16  }
   0x6   :  { %56 = vrot.lane.b32.xlu1 %v53_v4, %s1770_s9  ;;  %39 = vrot.lane.b32.xlu0 %v36_v5, %s1770_s9  ;;  %v613_v10 = vrot.slane %v1721_v7, %v1844_v8  ;;  %v609_v11 = vrot.slane %v1721_v7, %v1846_v9  ;;  %v377_v14 = vrot.slane %v1718_v13, %v1846_v9  ;;  %v1717_v32 = vld [vmem:[%s2617_s1 + $0x3] ss:$8 sm:$0xf]  ;;  %v1716_v37 = vld [vmem:[%s2617_s1 + $0x2] ss:$8 sm:$0xf] }
   0x7   :  { %v617_v15 = vrot.slane %v1721_v7, %v1852_v12  ;;  %v385_v16 = vrot.slane %v1718_v13, %v1852_v12  ;;  %v381_v17 = vrot.slane %v1718_v13, %v1844_v8  ;;  %v534_v19 = vrot.slane %v1720_v18, %v1844_v8  ;;  %s1777_s29 = smov 2   ;;  %v71_v48 = vld [vmem:[%s2617_s1] ss:$8 sm:$0xf]  ;;  %s1778_s11 = smov 111  }
   0x8   :  { %v530_v20 = vrot.slane %v1720_v18, %v1846_v9  ;;  %v456_v22 = vrot.slane %v1719_v21, %v1846_v9  ;;  %v538_v23 = vrot.slane %v1720_v18, %v1852_v12  ;;  %v464_v24 = vrot.slane %v1719_v21, %v1852_v12  ;;  %s1779_s0 = smov 94   ;;  %s1780_s12 = smov 96  }
   0x9   :  { %v460_v25 = vrot.slane %v1719_v21, %v1844_v8  ;;  %v112_v28 = vrot.slane %v1715_v27, %v1846_v9  ;;  %v621_v29 = vrot.slane %v1721_v7, %v1883_v26  ;;  %v120_v30 = vrot.slane %v1715_v27, %v1852_v12  ;;  %s1781_s15 = smov 127   ;;  %s1782_s16 = smov 112  }
   0xa   :  { %624 = vrot.lane.b32.xlu1 %v613_v10, %s1771_s13  ;;  %622 = vrot.lane.b32.xlu0 %v609_v11, %s1771_s13  ;;  %v116_v31 = vrot.slane %v1715_v27, %v1844_v8  ;;  %v269_v33 = vrot.slane %v1717_v32, %v1844_v8  ;;  %v265_v34 = vrot.slane %v1717_v32, %v1846_v9  ;;  %vm48_vm3 = vcmask 134144   ;;  %s1783_s17 = smov 126   ;;  %s1784_s18 = smov 110  }
   0xb   :  { %v389_v35 = vrot.slane %v1718_v13, %v1883_v26  ;;  %v273_v36 = vrot.slane %v1717_v32, %v1852_v12  ;;  %v191_v38 = vrot.slane %v1716_v37, %v1846_v9  ;;  %v542_v39 = vrot.slane %v1720_v18, %v1883_v26  ;;  %s1785_s21 = smov 95  }
   0xc   :  { %v199_v40 = vrot.slane %v1716_v37, %v1852_v12  ;;  %v195_v41 = vrot.slane %v1716_v37, %v1844_v8  ;;  %v124_v42 = vrot.slane %v1715_v27, %v1883_v26  ;;  %v468_v43 = vrot.slane %v1719_v21, %v1883_v26 }
   0xd   :  { %v203_v44 = vrot.slane %v1716_v37, %v1883_v26  ;;  %v277_v45 = vrot.slane %v1717_v32, %v1883_v26  ;;  %v76_v51 = vrot.slane %v71_v48, %v1846_v9  ;;  %v88_v61 = vrot.slane %v71_v48, %v1883_v26 }
   0xe   :  { %390 = vrot.lane.b32.xlu1 %v377_v14, %s1772_s14  ;;  %626 = vrot.lane.b32.xlu0 %v617_v15, %s1771_s13  ;;  %v80_v62 = vrot.slane %v71_v48, %v1844_v8  ;;  %v84_v63 = vrot.slane %v71_v48, %v1852_v12  ;;  %vm630_vm4 = vcmask 277504   ;;  %vm477_vm5 = vcmask 261120  }
   0xf   :  { %vm212_vm6 = vcmask 15360   ;;  %vm398_vm7 = vcmask 146432   ;;  %vm551_vm8 = vcmask 269312   ;;  %vm133_vm9 = vcmask 7168  }
  0x10   :  { %vm286_vm10 = vcmask 130048   ;;  %vm353_vm11 = vcmask 908288   ;;  %vm2625_vm12 = vcmask 769024   ;;  %vm506_vm13 = vcmask 785408  }
  0x11   :  { %vm241_vm14 = vcmask 1031168   ;;  %vm713_vm15 = vcmask 1041408   ;;  %vm432_vm1 = vcmask 900096  }
  0x12   :  { %394 = vrot.lane.b32.xlu1 %v385_v16, %s1772_s14  ;;  %392 = vrot.lane.b32.xlu0 %v381_v17, %s1772_s14 }
  0x16   :  { %545 = vrot.lane.b32.xlu1 %v534_v19, %s1773_s19  ;;  %543 = vrot.lane.b32.xlu0 %v530_v20, %s1773_s19 }
  0x1a   :  { %469 = vrot.lane.b32.xlu1 %v456_v22, %s1774_s20  ;;  %547 = vrot.lane.b32.xlu0 %v538_v23, %s1773_s19 }
  0x1e   :  { %473 = vrot.lane.b32.xlu1 %v464_v24, %s1774_s20  ;;  %471 = vrot.lane.b32.xlu0 %v460_v25, %s1774_s20 }
  0x22   :  { %125 = vrot.lane.b32.xlu1 %v112_v28, %s1775_s23  ;;  %628 = vrot.lane.b32.xlu0 %v621_v29, %s1771_s13 }
  0x26   :  { %129 = vrot.lane.b32.xlu1 %v120_v30, %s1775_s23  ;;  %127 = vrot.lane.b32.xlu0 %v116_v31, %s1775_s23 }
  0x2a   :  { %280 = vrot.lane.b32.xlu1 %v269_v33, %s1776_s26  ;;  %278 = vrot.lane.b32.xlu0 %v265_v34, %s1776_s26 }
  0x2e   :  { %396 = vrot.lane.b32.xlu1 %v389_v35, %s1772_s14  ;;  %282 = vrot.lane.b32.xlu0 %v273_v36, %s1776_s26 }
  0x32   :  { %204 = vrot.lane.b32.xlu1 %v191_v38, %s1777_s29  ;;  %549 = vrot.lane.b32.xlu0 %v542_v39, %s1773_s19 }
  0x36   :  { %208 = vrot.lane.b32.xlu1 %v199_v40, %s1777_s29  ;;  %206 = vrot.lane.b32.xlu0 %v195_v41, %s1777_s29 }
  0x3a   :  { %131 = vrot.lane.b32.xlu1 %v124_v42, %s1775_s23  ;;  %475 = vrot.lane.b32.xlu0 %v468_v43, %s1774_s20 }
  0x3e   :  { %210 = vrot.lane.b32.xlu1 %v203_v44, %s1777_s29  ;;  %284 = vrot.lane.b32.xlu0 %v277_v45, %s1776_s26 }
  0x74   :  { %v55_v46 = vpop.permute.xlu1 %54  ;;  %v38_v47 = vpop.permute.xlu0 %37 }
  0x75   :  { %46 = vst.msk [vmem:[#allocation2] sm:$0xf] %vm45_vm2, %v38_v47 }
  0x78   :  { %v57_v49 = vpop.permute.xlu1 %56  ;;  %v40_v50 = vpop.permute.xlu0 %39 }
  0x79   :  { %v58_v52 = vsel %vm30_vm0, %v55_v46, %v57_v49  ;;  %64 = vst.msk [vmem:[#allocation2 + $0x20] sm:$0xf] %vm48_vm3, %v57_v49  ;;  %v41_v53 = vsel %vm30_vm0, %v38_v47, %v40_v50  ;;  %49 = vst.msk [vmem:[#allocation2 + $0x10] sm:$0xf] %vm48_vm3, %v40_v50  ;;  %vm167_vm3 = vcmask 1039360  }
  0x7a   :  { %63 = vst [vmem:[#allocation2 + $0x18] sm:$0xf] %v58_v52  ;;  %47 = vst [vmem:[#allocation2 + $0x8] sm:$0xf] %v41_v53 }
  0x7b   :  { %62 = vst.msk [vmem:[#allocation2 + $0x10] sm:$0xf] %vm45_vm2, %v55_v46  ;;  %vm585_vm2 = vcmask 777216  }
  0x7c   :  { %v67_v54 = vld [vmem:[#allocation2] sm:$0xf]  ;;  %v1934_v55 = vpop.permute.xlu1 %624  ;;  %v1936_v57 = vpop.permute.xlu0 %622 }
  0x7d   :  { %v598_v56 = vld [vmem:[#allocation2] sm:$0xf]  ;;  %v93_v58 = vmul.f32 %v76_v51, %v67_v54  ;;  %v631_v40 = vsel %vm630_vm4, %v1936_v57, %v1934_v55 }
  0x7e   :  { %v639_v59 = vmul.f32 %v1936_v57, %v598_v56  ;;  %v333_v60 = vld [vmem:[#allocation2] sm:$0xf] }
  0x7f   :  { %343 = vrot.lane.b32.xlu1 %v333_v60, %s1778_s11  ;;  %97 = vst [vmem:[#allocation3 + $0xb0] sm:$0xf] %v93_v58  ;;  %v445_v17 = vld [vmem:[#allocation2] sm:$0xf] }
  0x80   :  { %649 = vrot.lane.b32.xlu0 %v639_v59, %s1779_s0  ;;  %v1944_v0 = vpop.permute.xlu1 %390  ;;  %v1946_v1 = vpop.permute.xlu0 %626  ;;  %v337_v7 = vld [vmem:[#allocation2 + $0x20] sm:$0xf] }
  0x81   :  { %v70_v2 = vld [vmem:[#allocation2 + $0x18] sm:$0xf]  ;;  %v68_v3 = vld [vmem:[#allocation2 + $0x8] sm:$0xf]  ;;  %v101_v24 = vld [vmem:[#allocation2] sm:$0xf] }
  0x82   :  { %v69_v4 = vld [vmem:[#allocation2 + $0x10] sm:$0xf]  ;;  %v96_v5 = vmul.f32 %v88_v61, %v70_v2  ;;  %v94_v6 = vmul.f32 %v80_v62, %v68_v3  ;;  %v334_v22 = vld [vmem:[#allocation2 + $0x8] sm:$0xf]  ;;  %v336_v28 = vld [vmem:[#allocation2 + $0x18] sm:$0xf] }
  0x83   :  { %v95_v10 = vmul.f32 %v84_v63, %v69_v4  ;;  %v254_v33 = vld [vmem:[#allocation2] sm:$0xf]  ;;  %v599_v39 = vld [vmem:[#allocation2 + $0x8] sm:$0xf]  ;;  %v335_v53 = vld [vmem:[#allocation2 + $0x10] sm:$0xf] }
  0x84   :  { %351 = vrot.lane.b32.xlu0 %v337_v7, %s1778_s11  ;;  %100 = vst [vmem:[#allocation3 + $0x48] sm:$0xf] %v96_v5  ;;  %98 = vst [vmem:[#allocation3 + $0xd0] sm:$0xf] %v94_v6  ;;  %v1949_v11 = vpop.permute.xlu1 %394  ;;  %v1951_v13 = vpop.permute.xlu0 %392  ;;  %v640_v41 = vmul.f32 %v631_v40, %v599_v39  ;;  %v180_v44 = vld [vmem:[#allocation2] sm:$0xf] }
  0x85   :  { %99 = vst [vmem:[#allocation3 + $0x10] sm:$0xf] %v95_v10  ;;  %v446_v47 = vld [vmem:[#allocation2 + $0x8] sm:$0xf]  ;;  %v366_v51 = vld [vmem:[#allocation2] sm:$0xf] }
  0x86   :  { %v601_v54 = vld [vmem:[#allocation2 + $0x18] sm:$0xf]  ;;  %v602_v57 = vld [vmem:[#allocation2 + $0x20] sm:$0xf]  ;;  %v407_v59 = vmul.f32 %v1944_v0, %v366_v51  ;;  %v181_v63 = vld [vmem:[#allocation2 + $0x8] sm:$0xf] }
  0x87   :  { %v519_v62 = vld [vmem:[#allocation2] sm:$0xf]  ;;  %v448_v10 = vld [vmem:[#allocation2 + $0x18] sm:$0xf] }
  0x88   :  { %v1953_v14 = vpop.permute.xlu1 %545  ;;  %v1955_v15 = vpop.permute.xlu0 %543  ;;  %v417_v6 = vrot.slane %v407_v59, 4  ;;  %v105_v7 = vld [vmem:[#allocation2 + $0x20] sm:$0xf] }
  0x89   :  { %v560_v5 = vmul.f32 %v1955_v15, %v519_v62  ;;  %v522_v62 = vld [vmem:[#allocation2 + $0x18] sm:$0xf] }
  0x8c   :  { %v470_v16 = vpop.permute.xlu1 %469  ;;  %v1957_v18 = vpop.permute.xlu0 %547 }
  0x8d   :  { %v486_v19 = vmul.f32 %v470_v16, %v445_v17 }
  0x8f   :  { %496 = vrot.lane.b32.xlu1 %v486_v19, %s1780_s12  ;;  %v399_v19 = vsel %vm398_vm7, %v1944_v0, %v1951_v13  ;;  %v632_v0 = vsel %vm630_vm4, %v1934_v55, %v1946_v1 }
  0x90   :  { %v1960_v20 = vpop.permute.xlu1 %473  ;;  %v1962_v21 = vpop.permute.xlu0 %471 }
  0x91   :  { %v478_v42 = vsel %vm477_vm5, %v470_v16, %v1962_v21 }
  0x92   :  { %v487_v48 = vmul.f32 %v478_v42, %v446_v47  ;;  %v479_v42 = vsel %vm477_vm5, %v1962_v21, %v1960_v20 }
  0x93   :  { %345 = vrot.lane.b32.xlu1 %v334_v22, %s1778_s11  ;;  %v367_v22 = vld [vmem:[#allocation2 + $0x8] sm:$0xf] }
  0x94   :  { %v1965_v23 = vpop.permute.xlu1 %125  ;;  %v629_v25 = vpop.permute.xlu0 %628 }
  0x95   :  { %v142_v27 = vmul.f32 %v1965_v23, %v101_v24  ;;  %v633_v49 = vsel %vm630_vm4, %v1946_v1, %v629_v25  ;;  %v643_v60 = vmul.f32 %v629_v25, %v602_v57  ;;  %v570_v24 = vrot.slane %v560_v5, 4 }
  0x96   :  { %v642_v56 = vmul.f32 %v633_v49, %v601_v54  ;;  %v370_v49 = vld [vmem:[#allocation2 + $0x20] sm:$0xf] }
  0x97   :  { %349 = vrot.lane.b32.xlu1 %v336_v28, %s1778_s11  ;;  %v152_v31 = vrot.slane %v142_v27, 4  ;;  %v408_v27 = vmul.f32 %v399_v19, %v367_v22  ;;  %v552_v28 = vsel %vm551_vm8, %v1955_v15, %v1953_v14  ;;  %v184_v22 = vld [vmem:[#allocation2 + $0x20] sm:$0xf] }
  0x98   :  { %v1969_v29 = vpop.permute.xlu1 %129  ;;  %v1971_v30 = vpop.permute.xlu0 %127 }
  0x99   :  { %v418_v39 = vrot.slane %v408_v27, 4  ;;  %v135_v19 = vsel %vm133_vm9, %v1971_v30, %v1969_v29 }
  0x9b   :  { %157 = vrot.lane.b32.xlu1 %v152_v31, %s1781_s15  ;;  %v449_v31 = vld [vmem:[#allocation2 + $0x20] sm:$0xf] }
  0x9c   :  { %v1974_v32 = vpop.permute.xlu1 %280  ;;  %v1976_v34 = vpop.permute.xlu0 %278 }
  0x9d   :  { %v295_v35 = vmul.f32 %v1976_v34, %v254_v33  ;;  %v520_v33 = vld [vmem:[#allocation2 + $0x8] sm:$0xf] }
  0x9e   :  { %v561_v40 = vmul.f32 %v552_v28, %v520_v33 }
  0x9f   :  { %v305_v36 = vrot.slane %v295_v35, 4 }
  0xa0   :  { %v1979_v37 = vpop.permute.xlu1 %396  ;;  %v1981_v38 = vpop.permute.xlu0 %282  ;;  %v571_v55 = vrot.slane %v561_v40, 4 }
  0xa1   :  { %310 = vrot.lane.b32.xlu1 %v305_v36, %s1782_s16  ;;  %v600_v36 = vld [vmem:[#allocation2 + $0x10] sm:$0xf]  ;;  %v401_v51 = vsel %vm398_vm7, %v1949_v11, %v1979_v37 }
  0xa2   :  { %v641_v15 = vmul.f32 %v632_v0, %v600_v36 }
  0xa4   :  { %v205_v43 = vpop.permute.xlu1 %204  ;;  %v1989_v45 = vpop.permute.xlu0 %549 }
  0xa5   :  { %v221_v46 = vmul.f32 %v205_v43, %v180_v44  ;;  %651 = vrot.lane.b32.xlu1 %v640_v41, %s1779_s0  ;;  %v134_v41 = vsel %vm133_vm9, %v1965_v23, %v1971_v30  ;;  %v287_v44 = vsel %vm286_vm10, %v1976_v34, %v1974_v32  ;;  %v411_v34 = vmul.f32 %v1979_v37, %v370_v49 }
  0xa6   :  { %v554_v59 = vsel %vm551_vm8, %v1957_v18, %v1989_v45  ;;  %v400_v37 = vsel %vm398_vm7, %v1951_v13, %v1949_v11  ;;  %v521_v11 = vld [vmem:[#allocation2 + $0x10] sm:$0xf] }
  0xa7   :  { %231 = vrot.lane.b32.xlu0 %v221_v46, %s1783_s17  ;;  %v447_v46 = vld [vmem:[#allocation2 + $0x10] sm:$0xf] }
  0xa8   :  { %v1995_v50 = vpop.permute.xlu0 %206  ;;  %v1998_v52 = vpop.permute.xlu1 %208  ;;  %v488_v23 = vmul.f32 %v479_v42, %v447_v46  ;;  %v183_v42 = vld [vmem:[#allocation2 + $0x18] sm:$0xf] }
  0xa9   :  { %498 = vrot.lane.b32.xlu1 %v487_v48, %s1780_s12  ;;  %v213_v58 = vsel %vm212_vm6, %v205_v43, %v1995_v50  ;;  %v102_v43 = vld [vmem:[#allocation2 + $0x8] sm:$0xf]  ;;  %v214_v47 = vsel %vm212_vm6, %v1995_v50, %v1998_v52 }
  0xaa   :  { %v222_v2 = vmul.f32 %v213_v58, %v181_v63  ;;  %v143_v1 = vmul.f32 %v134_v41, %v102_v43  ;;  %v255_v48 = vld [vmem:[#allocation2 + $0x8] sm:$0xf]  ;;  %v523_v58 = vld [vmem:[#allocation2 + $0x20] sm:$0xf]  ;;  %v257_v43 = vld [vmem:[#allocation2 + $0x18] sm:$0xf] }
  0xab   :  { %347 = vrot.lane.b32.xlu0 %v335_v53, %s1778_s11  ;;  %v296_v21 = vmul.f32 %v287_v44, %v255_v48  ;;  %v182_v53 = vld [vmem:[#allocation2 + $0x10] sm:$0xf] }
  0xac   :  { %v476_v61 = vpop.permute.xlu0 %475  ;;  %v2006_v3 = vpop.permute.xlu1 %131  ;;  %v223_v54 = vmul.f32 %v214_v47, %v182_v53 }
  0xad   :  { %655 = vrot.lane.b32.xlu1 %v642_v56, %s1779_s0  ;;  %v480_v4 = vsel %vm477_vm5, %v1960_v20, %v476_v61  ;;  %v146_v16 = vmul.f32 %v2006_v3, %v105_v7  ;;  %v490_v35 = vmul.f32 %v476_v61, %v449_v31  ;;  %v153_v20 = vrot.slane %v143_v1, 4  ;;  %v369_v56 = vld [vmem:[#allocation2 + $0x18] sm:$0xf] }
  0xae   :  { %v489_v17 = vmul.f32 %v480_v4, %v448_v10  ;;  %v306_v50 = vrot.slane %v296_v21, 4  ;;  %v410_v57 = vmul.f32 %v401_v51, %v369_v56  ;;  %v421_v61 = vrot.slane %v411_v34, 4  ;;  %v368_v4 = vld [vmem:[#allocation2 + $0x10] sm:$0xf] }
  0xaf   :  { %657 = vrot.lane.b32.xlu0 %v643_v60, %s1779_s0  ;;  %v156_v25 = vrot.slane %v146_v16, 4  ;;  %v564_v60 = vmul.f32 %v1989_v45, %v523_v58  ;;  %v553_v45 = vsel %vm551_vm8, %v1953_v14, %v1957_v18  ;;  %v103_v14 = vld [vmem:[#allocation2 + $0x10] sm:$0xf]  ;;  %v288_v31 = vsel %vm286_vm10, %v1974_v32, %v1981_v38 }
  0xb0   :  { %v420_v63 = vrot.slane %v410_v57, 4  ;;  %v211_v10 = vpop.permute.xlu1 %210  ;;  %v285_v16 = vpop.permute.xlu0 %284  ;;  %v144_v28 = vmul.f32 %v135_v19, %v103_v14  ;;  %v136_v36 = vsel %vm133_vm9, %v1969_v29, %v2006_v3  ;;  %v1786_v32 = vmov 0  }
  0xb1   :  { %233 = vrot.lane.b32.xlu1 %v222_v2, %s1783_s17  ;;  %v563_v2 = vmul.f32 %v554_v59, %v522_v62  ;;  %v574_v5 = vrot.slane %v564_v60, 4  ;;  %758 = vmatprep.mubr.bf16.mxu0 %v1786_v32  ;;  %v215_v29 = vsel %vm212_vm6, %v1998_v52, %v211_v10  ;;  %v289_v3 = vsel %vm286_vm10, %v1981_v38, %v285_v16 }
  0xb2   :  { %v154_v30 = vrot.slane %v144_v28, 4  ;;  %801 = vmatprep.mubr.bf16.mxu1 %v1786_v32  ;;  %1758 = vset.pattern.permute.xlu0 %v1786_v32  ;;  %v298_v1 = vmul.f32 %v289_v3, %v257_v43 }
  0xb3   :  { %422 = vrot.lane.b32.xlu0 %v417_v6, %s1784_s18  ;;  %v409_v6 = vmul.f32 %v400_v37, %v368_v4  ;;  %v573_v7 = vrot.slane %v563_v2, 4  ;;  %1759 = vset.pattern.permute.xlu1 %v1786_v32 }
  0xb4   :  { %v308_v44 = vrot.slane %v298_v1, 4 }
  0xb5   :  { %502 = vrot.lane.b32.xlu1 %v489_v17, %s1780_s12  ;;  %v419_v13 = vrot.slane %v409_v6, 4  ;;  %v562_v17 = vmul.f32 %v553_v45, %v521_v11 }
  0xb7   :  { %575 = vrot.lane.b32.xlu0 %v570_v24, %s1785_s21  ;;  %v258_v24 = vld [vmem:[#allocation2 + $0x20] sm:$0xf]  ;;  %v572_v18 = vrot.slane %v562_v17, 4 }
  0xb8   :  { %v299_v27 = vmul.f32 %v285_v16, %v258_v24 }
  0xb9   :  { %165 = vrot.lane.b32.xlu1 %v156_v25, %s1781_s15  ;;  %v225_v25 = vmul.f32 %v211_v10, %v184_v22 }
  0xba   :  { %v309_v33 = vrot.slane %v299_v27, 4 }
  0xbb   :  { %504 = vrot.lane.b32.xlu0 %v490_v35, %s1780_s12  ;;  %v256_v35 = vld [vmem:[#allocation2 + $0x10] sm:$0xf] }
  0xbc   :  { %v297_v0 = vmul.f32 %v288_v31, %v256_v35 }
  0xbd   :  { %424 = vrot.lane.b32.xlu1 %v418_v39, %s1784_s18  ;;  %v104_v39 = vld [vmem:[#allocation2 + $0x18] sm:$0xf] }
  0xbe   :  { %v307_v40 = vrot.slane %v297_v0, 4  ;;  %v145_v41 = vmul.f32 %v136_v36, %v104_v39 }
  0xbf   :  { %653 = vrot.lane.b32.xlu0 %v641_v15, %s1779_s0 }
  0xc0   :  { %v155_v15 = vrot.slane %v145_v41, 4 }
  0xc1   :  { %577 = vrot.lane.b32.xlu1 %v571_v55, %s1785_s21  ;;  %v224_v55 = vmul.f32 %v215_v29, %v183_v42 }
  0xc3   :  { %500 = vrot.lane.b32.xlu0 %v488_v23, %s1780_s12 }
  0xc5   :  { %159 = vrot.lane.b32.xlu1 %v153_v20, %s1781_s15 }
  0xc7   :  { %235 = vrot.lane.b32.xlu0 %v223_v54, %s1783_s17 }
  0xc9   :  { %312 = vrot.lane.b32.xlu1 %v306_v50, %s1782_s16 }
  0xcb   :  { %430 = vrot.lane.b32.xlu0 %v421_v61, %s1784_s18 }
  0xcd   :  { %428 = vrot.lane.b32.xlu1 %v420_v63, %s1784_s18 }
  0xcf   :  { %583 = vrot.lane.b32.xlu0 %v574_v5, %s1785_s21 }
  0xd1   :  { %581 = vrot.lane.b32.xlu1 %v573_v7, %s1785_s21 }
  0xd3   :  { %426 = vrot.lane.b32.xlu0 %v419_v13, %s1784_s18 }
  0xd5   :  { %239 = vrot.lane.b32.xlu1 %v225_v25, %s1783_s17 }
  0xd7   :  { %579 = vrot.lane.b32.xlu0 %v572_v18, %s1785_s21 }
  0xd9   :  { %318 = vrot.lane.b32.xlu1 %v309_v33, %s1782_s16 }
  0xdb   :  { %161 = vrot.lane.b32.xlu0 %v154_v30, %s1781_s15 }
  0xdf   :  { %314 = vrot.lane.b32.xlu0 %v307_v40, %s1782_s16 }
  0xe3   :  { %163 = vrot.lane.b32.xlu0 %v155_v15, %s1781_s15 }
  0xe7   :  { %237 = vrot.lane.b32.xlu0 %v224_v55, %s1783_s17 }
  0xeb   :  { %316 = vrot.lane.b32.xlu0 %v308_v44, %s1782_s16 }
  0xf1   :  { %v344_v46 = vpop.permute.xlu1 %343 }
  0xf2   :  { %v650_v47 = vpop.permute.xlu0 %649 }
  0xf6   :  { %v352_v38 = vpop.permute.xlu0 %351 }
 0x101   :  { %v497_v23 = vpop.permute.xlu1 %496 }
 0x105   :  { %v346_v48 = vpop.permute.xlu1 %345 }
 0x106   :  { %v354_v52 = vsel %vm353_vm11, %v344_v46, %v346_v48 }
 0x107   :  { %362 = vst [vmem:[#allocation3 + $0x80] sm:$0xf] %v354_v52 }
 0x109   :  { %v350_v20 = vpop.permute.xlu1 %349 }
 0x10a   :  { %v357_v21 = vsel %vm353_vm11, %v350_v20, %v352_v38 }
 0x10b   :  { %365 = vst [vmem:[#allocation3 + $0x98] sm:$0xf] %v357_v21 }
 0x10d   :  { %v158_v49 = vpop.permute.xlu1 %157 }
 0x113   :  { %v2092_v51 = vpop.permute.xlu1 %310 }
 0x117   :  { %v652_v53 = vpop.permute.xlu1 %651 }
 0x118   :  { %v660_v34 = vsel %vm2625_vm12, %v650_v47, %v652_v53 }
 0x119   :  { %668 = vst [vmem:[#allocation3 + $0x20] sm:$0xf] %v660_v34  ;;  %v232_v54 = vpop.permute.xlu0 %231 }
 0x11b   :  { %v499_v56 = vpop.permute.xlu1 %498 }
 0x11c   :  { %v507_v50 = vsel %vm506_vm13, %v497_v23, %v499_v56 }
 0x11d   :  { %515 = vst [vmem:[#allocation3 + $0xf8] sm:$0xf] %v507_v50  ;;  %v348_v57 = vpop.permute.xlu0 %347 }
 0x11e   :  { %v355_v58 = vsel %vm353_vm11, %v346_v48, %v348_v57  ;;  %v356_v59 = vsel %vm353_vm11, %v348_v57, %v350_v20 }
 0x11f   :  { %363 = vst [vmem:[#allocation3 + $0x110] sm:$0xf] %v355_v58  ;;  %364 = vst [vmem:[#allocation3 + $0x118] sm:$0xf] %v356_v59  ;;  %v656_v60 = vpop.permute.xlu1 %655 }
 0x120   :  { %v688_v28 = vld [vmem:[#allocation3 + $0x20] sm:$0xf] }
 0x121   :  { %v658_v61 = vpop.permute.xlu0 %657  ;;  %v700_v30 = vpack.c.bf16 %v688_v28, %v688_v28 }
 0x122   :  { %v663_v37 = vsel %vm2625_vm12, %v656_v60, %v658_v61 }
 0x123   :  { %671 = vst [vmem:[#allocation3 + $0xa0] sm:$0xf] %v663_v37  ;;  %v234_v62 = vpop.permute.xlu1 %233  ;;  %v715_v42 = vsel %vm713_vm15, %v700_v30, 0 }
 0x124   :  { %v242_v63 = vsel %vm241_vm14, %v232_v54, %v234_v62 }
 0x125   :  { %250 = vst [vmem:[#allocation3 + $0x108] sm:$0xf] %v242_v63  ;;  %v423_v2 = vpop.permute.xlu0 %422 }
 0x127   :  { %v503_v4 = vpop.permute.xlu1 %502 }
 0x129   :  { %v576_v5 = vpop.permute.xlu0 %575 }
 0x12a   :  { %v691_v6 = vld [vmem:[#allocation3 + $0xa0] sm:$0xf] }
 0x12b   :  { %v2100_v45 = vpop.permute.xlu1 %165  ;;  %v703_v7 = vpack.c.bf16 %v691_v6, %v691_v6 }
 0x12d   :  { %1725 = vmatprep.subr.msk.bf16.mxu1 %vm713_vm15, %v703_v7  ;;  %v505_v10 = vpop.permute.xlu0 %504 }
 0x12e   :  { %v510_v16 = vsel %vm506_vm13, %v503_v4, %v505_v10 }
 0x12f   :  { %518 = vst [vmem:[#allocation3 + $0x78] sm:$0xf] %v510_v16  ;;  %v425_v11 = vpop.permute.xlu1 %424 }
 0x130   :  { %v433_v13 = vsel %vm432_vm1, %v423_v2, %v425_v11 }
 0x131   :  { %441 = vst [vmem:[#allocation3 + $0x80] sm:$0xf0] %v433_v13  ;;  %v654_v17 = vpop.permute.xlu0 %653 }
 0x132   :  { %v661_v19 = vsel %vm2625_vm12, %v652_v53, %v654_v17  ;;  %v662_v22 = vsel %vm2625_vm12, %v654_v17, %v656_v60  ;;  %vm320_vm12 = vcmask 916480  }
 0x133   :  { %669 = vst [vmem:[#allocation3 + $0xc8] sm:$0xf] %v661_v19  ;;  %670 = vst [vmem:[#allocation3 + $0x90] sm:$0xf] %v662_v22  ;;  %v578_v24 = vpop.permute.xlu1 %577 }
 0x134   :  { %v586_v25 = vsel %vm585_vm2, %v576_v5, %v578_v24 }
 0x135   :  { %594 = vst [vmem:[#allocation3 + $0xf8] sm:$0xf0] %v586_v25  ;;  %v501_v27 = vpop.permute.xlu0 %500 }
 0x136   :  { %v508_v14 = vsel %vm506_vm13, %v499_v56, %v501_v27  ;;  %v509_v18 = vsel %vm506_vm13, %v501_v27, %v503_v4 }
 0x137   :  { %516 = vst [vmem:[#allocation3 + $0x38] sm:$0xf] %v508_v14  ;;  %517 = vst [vmem:[#allocation3 + $0x8] sm:$0xf] %v509_v18  ;;  %v160_v31 = vpop.permute.xlu1 %159  ;;  %v1762_v14 = vld [vmem:[%s2618_s2] sm:$0xff]  }
 0x138   :  { %v168_v33 = vsel %vm167_vm3, %v158_v49, %v160_v31  ;;  %v680_v63 = vld [vmem:[#allocation3 + $0x80] sm:$0xff] }
 0x139   :  { %176 = vst [vmem:[#allocation3 + $0xb0] sm:$0xf0] %v168_v33  ;;  %v2111_v35 = vpop.permute.xlu0 %235 }
 0x13a   :  { %v243_v0 = vsel %vm241_vm14, %v234_v62, %v2111_v35  ;;  %v689_v36 = vld [vmem:[#allocation3 + $0xc8] sm:$0xf]  ;;  %v690_v39 = vld [vmem:[#allocation3 + $0x90] sm:$0xf] }
 0x13b   :  { %251 = vst [vmem:[#allocation3 + $0x68] sm:$0xf] %v243_v0  ;;  %v313_v40 = vpop.permute.xlu1 %312  ;;  %v701_v41 = vpack.c.bf16 %v689_v36, %v689_v36  ;;  %v702_v15 = vpack.c.bf16 %v690_v39, %v690_v39 }
 0x13c   :  { %v321_v29 = vsel %vm320_vm12, %v2092_v51, %v313_v40  ;;  %v684_v57 = vld [vmem:[#allocation3 + $0xf8] sm:$0xff] }
 0x13d   :  { %329 = vst [vmem:[#allocation3 + $0x108] sm:$0xf0] %v321_v29  ;;  %1723 = vmatprep.subr.msk.bf16.mxu0 %vm713_vm15, %v701_v41  ;;  %v431_v3 = vpop.permute.xlu0 %430  ;;  %v721_v43 = vsel %vm713_vm15, %v702_v15, 0  ;;  %v696_v2 = vpack.c.bf16 %v684_v57, %v680_v63  ;;  %vm709_vm15 = vcmask 293888  }
 0x13e   :  { %737 = vmatpush1.bf16.msra.mxu0 %v715_v42  ;;  %780 = vmatpush1.bf16.msra.mxu1 %v721_v43  ;;  %v1733_v57 = vld [vmem:[%s2617_s1 + $0x20] ss:$8 sm:$0xf]  ;;  %v1732_v63 = vld [vmem:[%s2617_s1 + $0x7] ss:$8 sm:$0xf] }
 0x13f   :  { %v429_v55 = vpop.permute.xlu1 %428 }
 0x140   :  { %v436_v1 = vsel %vm432_vm1, %v429_v55, %v431_v3 }
 0x141   :  { %444 = vst [vmem:[#allocation3 + $0x98] sm:$0xf0] %v436_v1  ;;  %v584_v44 = vpop.permute.xlu0 %583 }
 0x143   :  { %v582_v46 = vpop.permute.xlu1 %581 }
 0x144   :  { %v589_v23 = vsel %vm585_vm2, %v582_v46, %v584_v44  ;;  %v676_v16 = vld [vmem:[#allocation3 + $0x108] sm:$0xff] }
 0x145   :  { %597 = vst [vmem:[#allocation3 + $0x78] sm:$0xf0] %v589_v23  ;;  %v427_v47 = vpop.permute.xlu0 %426 }
 0x146   :  { %v434_v48 = vsel %vm432_vm1, %v425_v11, %v427_v47  ;;  %v435_v52 = vsel %vm432_vm1, %v427_v47, %v429_v55 }
 0x147   :  { %442 = vst [vmem:[#allocation3 + $0x110] sm:$0xf0] %v434_v48  ;;  %443 = vst [vmem:[#allocation3 + $0x118] sm:$0xf0] %v435_v52  ;;  %v240_v7 = vpop.permute.xlu1 %239 }
 0x148   :  { %v683_v49 = vld [vmem:[#allocation3 + $0x98] sm:$0xff] }
 0x149   :  { %v580_v38 = vpop.permute.xlu0 %579 }
 0x14a   :  { %v587_v20 = vsel %vm585_vm2, %v578_v24, %v580_v38  ;;  %v588_v21 = vsel %vm585_vm2, %v580_v38, %v582_v46  ;;  %v672_v24 = vld [vmem:[#allocation3 + $0xb0] sm:$0xff] }
 0x14b   :  { %595 = vst [vmem:[#allocation3 + $0x38] sm:$0xf0] %v587_v20  ;;  %596 = vst [vmem:[#allocation3 + $0x8] sm:$0xf0] %v588_v21  ;;  %v692_v25 = vpack.c.bf16 %v676_v16, %v672_v24  ;;  %v319_v27 = vpop.permute.xlu1 %318 }
 0x14c   :  { %v687_v51 = vld [vmem:[#allocation3 + $0x78] sm:$0xff] }
 0x14d   :  { %v162_v53 = vpop.permute.xlu0 %161  ;;  %v699_v34 = vpack.c.bf16 %v687_v51, %v683_v49 }
 0x14e   :  { %v169_v54 = vsel %vm167_vm3, %v160_v31, %v162_v53  ;;  %v681_v50 = vld [vmem:[#allocation3 + $0x110] sm:$0xff]  ;;  %v682_v60 = vld [vmem:[#allocation3 + $0x118] sm:$0xff] }
 0x14f   :  { %177 = vst [vmem:[#allocation3 + $0xd0] sm:$0xf0] %v169_v54  ;;  %781 = vmatprep.subr.bf16.mxu1 %v699_v34  ;;  %v812_v34 = vld [vmem:[%s2619_s3] sm:$0xff] }
 0x151   :  { %v315_v56 = vpop.permute.xlu0 %314 }
 0x152   :  { %v322_v58 = vsel %vm320_vm12, %v313_v40, %v315_v56  ;;  %v685_v59 = vld [vmem:[#allocation3 + $0x38] sm:$0xff]  ;;  %v686_v61 = vld [vmem:[#allocation3 + $0x8] sm:$0xff] }
 0x153   :  { %330 = vst [vmem:[#allocation3 + $0x68] sm:$0xf0] %v322_v58  ;;  %v697_v37 = vpack.c.bf16 %v685_v59, %v681_v50  ;;  %v698_v62 = vpack.c.bf16 %v686_v61, %v682_v60  ;;  %v814_v50 = vld [vmem:[%s2620_s4] sm:$0xff]  ;;  %v1444_v59 = vrot.slane %v1733_v57, %v1852_v12 }
 0x154   :  { %v1731_v61 = vld [vmem:[%s2617_s1 + $0x6] ss:$8 sm:$0xf] }
 0x155   :  { %738 = vmatprep.subr.bf16.mxu0 %v697_v37  ;;  %782 = vmatpush1.bf16.msra.mxu1 %v698_v62  ;;  %v164_v4 = vpop.permute.xlu0 %163  ;;  %v1436_v37 = vrot.slane %v1733_v57, %v1846_v9  ;;  %v1298_v62 = vrot.slane %v1731_v61, %v1844_v8 }
 0x156   :  { %v170_v5 = vsel %vm167_vm3, %v162_v53, %v164_v4  ;;  %v171_v6 = vsel %vm167_vm3, %v164_v4, %v2100_v45  ;;  %739 = vmatpush1.bf16.msra.mxu0 %v696_v2  ;;  %v673_v17 = vld [vmem:[#allocation3 + $0xd0] sm:$0xff]  ;;  %v1440_v2 = vrot.slane %v1733_v57, %v1844_v8  ;;  %v1365_v4 = vrot.slane %v1732_v63, %v1846_v9 }
 0x157   :  { %178 = vst [vmem:[#allocation3 + $0x10] sm:$0xf0] %v170_v5  ;;  %179 = vst [vmem:[#allocation3 + $0x48] sm:$0xf0] %v171_v6  ;;  %v1294_v5 = vrot.slane %v1731_v61, %v1846_v9  ;;  %v1373_v6 = vrot.slane %v1732_v63, %v1852_v12 }
 0x159   :  { %v238_v10 = vpop.permute.xlu0 %237 }
 0x15a   :  { %v244_v11 = vsel %vm241_vm14, %v2111_v35, %v238_v10  ;;  %v245_v13 = vsel %vm241_vm14, %v238_v10, %v240_v7  ;;  %v677_v19 = vld [vmem:[#allocation3 + $0x68] sm:$0xff]  ;;  %v1302_v10 = vrot.slane %v1731_v61, %v1852_v12 }
 0x15b   :  { %252 = vst [vmem:[#allocation3 + $0x30] sm:$0xf] %v244_v11  ;;  %253 = vst [vmem:[#allocation3 + $0x18] sm:$0xf] %v245_v13  ;;  %v693_v22 = vpack.c.bf16 %v677_v19, %v673_v17  ;;  %v1369_v11 = vrot.slane %v1732_v63, %v1844_v8  ;;  %v1448_v17 = vrot.slane %v1733_v57, %v1883_v26 }
 0x15c   :  { %v1730_v7 = vld [vmem:[%s2617_s1 + $0x5] ss:$8 sm:$0xf]  ;;  %v1377_v19 = vrot.slane %v1732_v63, %v1883_v26 }
 0x15d   :  { %740 = vmatprep.subr.bf16.mxu0 %v693_v22  ;;  %v317_v45 = vpop.permute.xlu0 %316  ;;  %v1223_v16 = vrot.slane %v1730_v7, %v1846_v9  ;;  %v1231_v13 = vrot.slane %v1730_v7, %v1852_v12  ;;  %v1728_v22 = vld [vmem:[%s2617_s1 + $0x2] ss:$8 sm:$0xf]  ;;  %v1227_v24 = vrot.slane %v1730_v7, %v1844_v8 }
 0x15e   :  { %v323_v18 = vsel %vm320_vm12, %v315_v56, %v317_v45  ;;  %v324_v28 = vsel %vm320_vm12, %v317_v45, %v319_v27  ;;  %741 = vmatpush1.bf16.msra.mxu0 %v692_v25  ;;  %v675_v31 = vld [vmem:[#allocation3 + $0x48] sm:$0xff]  ;;  %v674_v35 = vld [vmem:[#allocation3 + $0x10] sm:$0xff]  ;;  %v1053_v25 = vrot.slane %v1728_v22, %v1844_v8  ;;  %v1306_v45 = vrot.slane %v1731_v61, %v1883_v26 }
 0x15f   :  { %331 = vst [vmem:[#allocation3 + $0x30] sm:$0xf0] %v323_v18  ;;  %332 = vst [vmem:[#allocation3 + $0x18] sm:$0xf0] %v324_v28  ;;  %v1049_v18 = vrot.slane %v1728_v22, %v1846_v9 }
 0x160   :  { %v1729_v27 = vld [vmem:[%s2617_s1 + $0x3] ss:$8 sm:$0xf] }
 0x161   :  { %1724 = vmatmul.mubr.msk.bf16.vlgmr.msra.gmra.mxu0 %vm709_vm15, %v1762_v14  ;;  %v1128_v28 = vrot.slane %v1729_v27, %v1852_v12 }
 0x162   :  { %1602 = vmatprep.mubr.bf16.mxu0 %v1786_v32 }
 0x166   :  { %v679_v33 = vld [vmem:[#allocation3 + $0x18] sm:$0xff]  ;;  %v678_v30 = vld [vmem:[#allocation3 + $0x30] sm:$0xff] }
 0x167   :  { %v695_v0 = vpack.c.bf16 %v679_v33, %v675_v31  ;;  %v694_v36 = vpack.c.bf16 %v678_v30, %v674_v35  ;;  %v1727_v31 = vld [vmem:[%s2617_s1 + $0x1] ss:$8 sm:$0xf]  ;;  %v1057_v33 = vrot.slane %v1728_v22, %v1852_v12  ;;  %v1124_v30 = vrot.slane %v1729_v27, %v1844_v8 }
 0x168   :  { %v978_v35 = vrot.slane %v1727_v31, %v1846_v9 }
 0x169   :  { %783 = vmatprep.subr.bf16.mxu1 %v695_v0  ;;  %v986_v0 = vrot.slane %v1727_v31, %v1852_v12 }
 0x16a   :  { %784 = vmatpush1.bf16.msra.mxu1 %v694_v36  ;;  %v1235_v36 = vrot.slane %v1730_v7, %v1883_v26 }
 0x16d   :  { %1726 = vmatmul.mubr.msk.bf16.vlgmr.msra.gmra.mxu1 %vm709_vm15, %v1762_v14  ;;  %v1120_v14 = vrot.slane %v1729_v27, %v1846_v9  ;;  %vm927_vm15 = vcmask 1047688  }
 0x16e   :  { %1643 = vmatprep.mubr.bf16.mxu1 %v1786_v32 }
 0x221   :  { %v2141_v39 = vpop.f32.mrf.mxu0 }
 0x223   :  { %v2143_v40 = vpop.f32.mrf.mxu0 }
 0x224   :  { %v816_v41 = vadd.f32 %v2143_v40, %v2141_v39 }
 0x22d   :  { %v2147_v15 = vpop.f32.mrf.mxu1 }
 0x22e   :  { %v817_v29 = vadd.f32 %v816_v41, %v2147_v15  ;;  %v1132_v41 = vrot.slane %v1729_v27, %v1883_v26 }
 0x22f   :  { %v2150_v3 = vpop.f32.mrf.mxu1 }
 0x230   :  { %v818_v42 = vadd.f32 %v817_v29, %v2150_v3  ;;  %v982_v29 = vrot.slane %v1727_v31, %v1844_v8 }
 0x232   :  { %819 = vadd.xlane.f32.xlu0 %v818_v42 }
 0x2bb   :  { %v820_v43 = vpop.xlane.xlu0 %819 }
 0x2bc   :  { %v827_v55 = vmul.f32 0.001953125, %v820_v43 }
 0x2be   :  { %v829_v32 = vsub.f32 %v2141_v39, %v827_v55  ;;  %v830_v1 = vsub.f32 %v2143_v40, %v827_v55  ;;  %v831_v44 = vsub.f32 %v2147_v15, %v827_v55  ;;  %v832_v46 = vsub.f32 %v2150_v3, %v827_v55 }
 0x2c0   :  { %v837_v23 = vmul.f32 %v829_v32, %v829_v32  ;;  %v838_v47 = vmul.f32 %v830_v1, %v830_v1  ;;  %v839_v48 = vmul.f32 %v831_v44, %v831_v44  ;;  %v840_v38 = vmul.f32 %v832_v46, %v832_v46 }
 0x2c2   :  { %v845_v52 = vadd.f32 %v838_v47, %v837_v23 }
 0x2c4   :  { %v846_v20 = vadd.f32 %v845_v52, %v839_v48 }
 0x2c6   :  { %v847_v21 = vadd.f32 %v846_v20, %v840_v38 }
 0x2c8   :  { %848 = vadd.xlane.f32.xlu1 %v847_v21 }
 0x351   :  { %v849_v49 = vpop.xlane.xlu1 %848 }
 0x352   :  { %v855_v51 = vmul.f32 0.001953125, %v849_v49 }
 0x354   :  { %v857_v53 = vadd.f32 1e-05, %v855_v51 }
 0x356   :  { %1763 = vrsqrt.f32 %v857_v53 }
 0x363   :  { %v1764_v54 = vpop.eup %1763 }
 0x364   :  { %v861_v56 = vmul.f32 %v1764_v54, %v812_v34 }
 0x366   :  { %865 = vperm.xlu0 %1758, %v861_v56   ;;  %v881_v58 = vmul.f32 %v861_v56, %v827_v55 }
 0x368   :  { %v883_v60 = vsub.f32 %v814_v50, %v881_v58 }
 0x36a   :  { %887 = vperm.xlu1 %1759, %v883_v60   ;;  %1453 = vrot.lane.b32.xlu0 %v1444_v59, %s1771_s13  ;;  %v990_v59 = vrot.slane %v1727_v31, %v1883_v26 }
 0x36e   :  { %1449 = vrot.lane.b32.xlu1 %v1436_v37, %s1771_s13  ;;  %1309 = vrot.lane.b32.xlu0 %v1298_v62, %s1774_s20 }
 0x372   :  { %1451 = vrot.lane.b32.xlu1 %v1440_v2, %s1771_s13  ;;  %1378 = vrot.lane.b32.xlu0 %v1365_v4, %s1773_s19 }
 0x376   :  { %1307 = vrot.lane.b32.xlu1 %v1294_v5, %s1774_s20  ;;  %1382 = vrot.lane.b32.xlu0 %v1373_v6, %s1773_s19 }
 0x37a   :  { %1311 = vrot.lane.b32.xlu1 %v1302_v10, %s1774_s20  ;;  %1236 = vrot.lane.b32.xlu0 %v1223_v16, %s1772_s14 }
 0x37e   :  { %1380 = vrot.lane.b32.xlu1 %v1369_v11, %s1773_s19  ;;  %1240 = vrot.lane.b32.xlu0 %v1231_v13, %s1772_s14 }
 0x382   :  { %1455 = vrot.lane.b32.xlu1 %v1448_v17, %s1771_s13  ;;  %1384 = vrot.lane.b32.xlu0 %v1377_v19, %s1773_s19  ;;  %v938_v17 = vld [vmem:[%s2617_s1] ss:$8 sm:$0xf] }
 0x386   :  { %1238 = vrot.lane.b32.xlu1 %v1227_v24, %s1772_s14  ;;  %1064 = vrot.lane.b32.xlu0 %v1053_v25, %s1777_s29 }
 0x38a   :  { %1313 = vrot.lane.b32.xlu1 %v1306_v45, %s1774_s20  ;;  %1133 = vrot.lane.b32.xlu0 %v1120_v14, %s1776_s26 }
 0x38e   :  { %1062 = vrot.lane.b32.xlu1 %v1049_v18, %s1777_s29  ;;  %1137 = vrot.lane.b32.xlu0 %v1128_v28, %s1776_s26  ;;  %v943_v28 = vrot.slane %v938_v17, %v1846_v9 }
 0x392   :  { %1066 = vrot.lane.b32.xlu1 %v1057_v33, %s1777_s29  ;;  %991 = vrot.lane.b32.xlu0 %v978_v35, %s1775_s23  ;;  %v955_v33 = vrot.slane %v938_v17, %v1883_v26 }
 0x396   :  { %1135 = vrot.lane.b32.xlu1 %v1124_v30, %s1776_s26  ;;  %995 = vrot.lane.b32.xlu0 %v986_v0, %s1775_s23 }
 0x39a   :  { %1242 = vrot.lane.b32.xlu1 %v1235_v36, %s1772_s14  ;;  %1139 = vrot.lane.b32.xlu0 %v1132_v41, %s1776_s26 }
 0x39e   :  { %993 = vrot.lane.b32.xlu1 %v982_v29, %s1775_s23 }
 0x3e1   :  { %v866_v42 = vpop.permute.xlu0 %865 }
 0x3e2   :  { %v873_v43 = vmul.f32 %v866_v42, %v2141_v39  ;;  %v874_v1 = vmul.f32 %v866_v42, %v2143_v40  ;;  %v875_v52 = vmul.f32 %v866_v42, %v2147_v15  ;;  %v876_v49 = vmul.f32 %v866_v42, %v2150_v3 }
 0x3e3   :  { %v1061_v3 = vrot.slane %v1728_v22, %v1883_v26  ;;  %v947_v22 = vrot.slane %v938_v17, %v1844_v8  ;;  %v951_v8 = vrot.slane %v938_v17, %v1852_v12 }
 0x3e5   :  { %v888_v55 = vpop.permute.xlu1 %887  ;;  %v2237_v32 = vpop.permute.xlu0 %1453 }
 0x3e6   :  { %v895_v44 = vadd.f32 %v888_v55, %v873_v43  ;;  %v896_v46 = vadd.f32 %v888_v55, %v874_v1  ;;  %v897_v38 = vadd.f32 %v888_v55, %v875_v52  ;;  %v898_v51 = vadd.f32 %v888_v55, %v876_v49 }
 0x3e8   :  { %v903_v23 = vmax.f32 %v895_v44, 0.0  ;;  %v904_v20 = vmax.f32 %v896_v46, 0.0  ;;  %v905_v53 = vmax.f32 %v897_v38, 0.0  ;;  %v906_v54 = vmax.f32 %v898_v51, 0.0 }
 0x3e9   :  { %v2240_v47 = vpop.permute.xlu1 %1449  ;;  %v2242_v48 = vpop.permute.xlu0 %1309 }
 0x3ea   :  { %911 = vrot.lane.b32.xlu1 %v903_v23, %s1770_s9 }
 0x3ed   :  { %v2246_v21 = vpop.permute.xlu1 %1451  ;;  %v2248_v39 = vpop.permute.xlu0 %1378 }
 0x3ee   :  { %913 = vrot.lane.b32.xlu1 %v904_v20, %s1770_s9  ;;  %v2255_v40 = vsel %vm630_vm4, %v2246_v21, %v2237_v32  ;;  %v1457_v38 = vsel %vm630_vm4, %v2240_v47, %v2246_v21 }
 0x3f1   :  { %v2257_v15 = vpop.permute.xlu1 %1307  ;;  %v2260_v34 = vpop.permute.xlu0 %1382 }
 0x3f2   :  { %915 = vrot.lane.b32.xlu1 %v905_v53, %s1770_s9  ;;  %v1315_v51 = vsel %vm477_vm5, %v2257_v15, %v2242_v48 }
 0x3f5   :  { %v2262_v56 = vpop.permute.xlu1 %1311  ;;  %v2273_v58 = vpop.permute.xlu0 %1236 }
 0x3f6   :  { %917 = vrot.lane.b32.xlu1 %v906_v54, %s1770_s9  ;;  %v2269_v50 = vsel %vm477_vm5, %v2242_v48, %v2262_v56 }
 0x3f9   :  { %v2271_v57 = vpop.permute.xlu1 %1380  ;;  %v2283_v37 = vpop.permute.xlu0 %1240 }
 0x3fa   :  { %1068 = vrot.lane.b32.xlu1 %v1061_v3, %s1777_s29  ;;  %v1387_v60 = vsel %vm551_vm8, %v2271_v57, %v2260_v34 }
 0x3fd   :  { %v2280_v61 = vpop.permute.xlu1 %1455  ;;  %v2300_v10 = vpop.permute.xlu0 %1384 }
 0x3fe   :  { %997 = vrot.lane.b32.xlu1 %v990_v59, %s1775_s23  ;;  %v1459_v48 = vsel %vm630_vm4, %v2237_v32, %v2280_v61 }
 0x401   :  { %v2285_v62 = vpop.permute.xlu1 %1238  ;;  %v2304_v11 = vpop.permute.xlu0 %1064 }
 0x402   :  { %v1245_v63 = vsel %vm398_vm7, %v2285_v62, %v2283_v37 }
 0x405   :  { %v2290_v2 = vpop.permute.xlu1 %1313  ;;  %v2309_v19 = vpop.permute.xlu0 %1133 }
 0x406   :  { %v1317_v32 = vsel %vm477_vm5, %v2262_v56, %v2290_v2  ;;  %vm1557_vm5 = vcmask 1043456  }
 0x409   :  { %v2292_v4 = vpop.permute.xlu1 %1062  ;;  %v2319_v45 = vpop.permute.xlu0 %1137 }
 0x40a   :  { %v1070_v17 = vsel %vm212_vm6, %v2292_v4, %v2304_v11 }
 0x40d   :  { %v2294_v5 = vpop.permute.xlu1 %1066  ;;  %v992_v46 = vpop.permute.xlu0 %991 }
 0x40e   :  { %v1071_v35 = vsel %vm212_vm6, %v2304_v11, %v2294_v5 }
 0x411   :  { %v2296_v6 = vpop.permute.xlu1 %1135  ;;  %v996_v56 = vpop.permute.xlu0 %995 }
 0x412   :  { %v1142_v9 = vsel %vm286_vm10, %v2296_v6, %v2319_v45 }
 0x415   :  { %v2298_v7 = vpop.permute.xlu1 %1242 }
 0x419   :  { %v2302_v16 = vpop.permute.xlu1 %993 }
 0x45c   :  { %v912_v13 = vpop.permute.xlu1 %911 }
 0x45d   :  { %928 = vst.msk [vmem:[#allocation2] sm:$0xff] %vm927_vm15, %v912_v13 }
 0x460   :  { %v914_v24 = vpop.permute.xlu1 %913 }
 0x461   :  { %v2313_v25 = vsel %vm30_vm0, %v912_v13, %v914_v24 }
 0x462   :  { %929 = vst [vmem:[#allocation2 + $0x8] sm:$0xff] %v2313_v25  ;;  %v2317_v27 = vmul.f32 %v947_v22, %v2313_v25  ;;  %v1466_v49 = vmul.f32 %v1457_v38, %v2313_v25  ;;  %v1324_v54 = vmul.f32 %v1315_v51, %v2313_v25 }
 0x464   :  { %v916_v14 = vpop.permute.xlu1 %915  ;;  %v2321_v18 = vld [vmem:[#allocation2] sm:$0xff]  ;;  %965 = vst [vmem:[#allocation3 + $0xd0] sm:$0xff] %v2317_v27 }
 0x465   :  { %v2325_v31 = vsel %vm30_vm0, %v914_v24, %v916_v14  ;;  %1191 = vrot.lane.b32.xlu1 %v2321_v18, %s1778_s11  ;;  %v2352_v41 = vmul.f32 %v2321_v18, %v943_v28  ;;  %v1323_v1 = vmul.f32 %v2257_v15, %v2321_v18  ;;  %v1078_v44 = vmul.f32 %v2321_v18, %v2292_v4 }
 0x466   :  { %930 = vst [vmem:[#allocation2 + $0x10] sm:$0xff] %v2325_v31  ;;  %v2340_v30 = vmul.f32 %v1387_v60, %v2325_v31  ;;  %v2343_v0 = vmul.f32 %v1245_v63, %v2325_v31  ;;  %v2346_v12 = vmul.f32 %v1071_v35, %v2325_v31  ;;  %v2349_v26 = vmul.f32 %v1142_v9, %v2325_v31 }
 0x467   :  { %v2361_v42 = vmul.f32 %v951_v8, %v2325_v31  ;;  %964 = vst [vmem:[#allocation3 + $0xb0] sm:$0xff] %v2352_v41  ;;  %v1465_v23 = vmul.f32 %v2240_v47, %v2321_v18  ;;  %v1007_v52 = vmul.f32 %v2321_v18, %v992_v46  ;;  %v1394_v53 = vmul.f32 %v2248_v39, %v2321_v18 }
 0x468   :  { %v918_v36 = vpop.permute.xlu1 %917  ;;  %v1386_v47 = vsel %vm551_vm8, %v2248_v39, %v2271_v57  ;;  %v1244_v39 = vsel %vm398_vm7, %v2273_v58, %v2285_v62  ;;  %v1252_v57 = vmul.f32 %v2273_v58, %v2321_v18  ;;  %v1388_v58 = vsel %vm551_vm8, %v2260_v34, %v2300_v10  ;;  %v1140_v34 = vpop.permute.xlu0 %1139 }
 0x469   :  { %v2355_v29 = vsel %vm30_vm0, %v916_v14, %v918_v36  ;;  %932 = vst.msk [vmem:[#allocation2 + $0x20] sm:$0xff] %vm30_vm0, %v918_v36  ;;  %1193 = vrot.lane.b32.xlu1 %v2313_v25, %s1778_s11  ;;  %966 = vst [vmem:[#allocation3 + $0x10] sm:$0xff] %v2361_v42  ;;  %v1395_v3 = vmul.f32 %v1386_v47, %v2313_v25  ;;  %v1253_v60 = vmul.f32 %v1244_v39, %v2313_v25  ;;  %v2503_v36 = vpop.f32.mrf.mxu1  ;;  %vm2626_vm0 = vcmask 769024  }
 0x46a   :  { %931 = vst [vmem:[#allocation2 + $0x18] sm:$0xff] %v2355_v29  ;;  %v2366_v43 = vmul.f32 %v955_v33, %v2355_v29  ;;  %v1468_v59 = vmul.f32 %v1459_v48, %v2355_v29  ;;  %v1326_v63 = vmul.f32 %v1317_v32, %v2355_v29  ;;  %v1149_v62 = vmul.f32 %v2321_v18, %v2309_v19  ;;  %vm2627_vm4 = vmmov %vm2626_vm0 }
 0x46b   :  { %v1397_v13 = vmul.f32 %v1388_v58, %v2355_v29  ;;  %v1079_v24 = vmul.f32 %v1070_v17, %v2313_v25  ;;  %v1246_v4 = vsel %vm398_vm7, %v2283_v37, %v2298_v7  ;;  %v1467_v11 = vmul.f32 %v2255_v40, %v2325_v31  ;;  %vm2629_vm7 = vmmov %vm2626_vm0 }
 0x46c   :  { %967 = vst [vmem:[#allocation3 + $0x48] sm:$0xff] %v2366_v43  ;;  %v1255_v28 = vmul.f32 %v1246_v4, %v2355_v29  ;;  %vm1553_vm8 = vcmask 588800  }
 0x46d   :  { %1197 = vrot.lane.b32.xlu1 %v2355_v29, %s1778_s11 }
 0x470   :  { %v2372_v55 = vld [vmem:[#allocation2 + $0x20] sm:$0xff] }
 0x471   :  { %1199 = vrot.lane.b32.xlu0 %v2372_v55, %s1778_s11  ;;  %1333 = vrot.lane.b32.xlu1 %v1323_v1, %s1780_s12  ;;  %v1469_v20 = vmul.f32 %v2280_v61, %v2372_v55  ;;  %v1327_v21 = vmul.f32 %v2290_v2, %v2372_v55  ;;  %v1398_v15 = vmul.f32 %v2300_v10, %v2372_v55  ;;  %v1069_v2 = vpop.permute.xlu1 %1068 }
 0x472   :  { %v1256_v61 = vmul.f32 %v2298_v7, %v2372_v55  ;;  %v1082_v22 = vmul.f32 %v1069_v2, %v2372_v55  ;;  %v1141_v10 = vsel %vm286_vm10, %v2309_v19, %v2296_v6  ;;  %v1153_v14 = vmul.f32 %v1140_v34, %v2372_v55 }
 0x473   :  { %v1150_v18 = vmul.f32 %v1141_v10, %v2313_v25  ;;  %v999_v6 = vsel %vm133_vm9, %v992_v46, %v2302_v16  ;;  %v1325_v19 = vmul.f32 %v2269_v50, %v2325_v31  ;;  %v1072_v37 = vsel %vm212_vm6, %v2294_v5, %v1069_v2  ;;  %vm2628_vm6 = vmmov %vm2626_vm0 }
 0x474   :  { %v1008_v8 = vmul.f32 %v999_v6, %v2313_v25  ;;  %v1081_v40 = vmul.f32 %v1072_v37, %v2355_v29  ;;  %v1143_v7 = vsel %vm286_vm10, %v2319_v45, %v1140_v34  ;;  %v1000_v45 = vsel %vm133_vm9, %v2302_v16, %v996_v56 }
 0x475   :  { %1195 = vrot.lane.b32.xlu0 %v2325_v31, %s1778_s11  ;;  %1088 = vrot.lane.b32.xlu1 %v1078_v44, %s1783_s17  ;;  %v1152_v50 = vmul.f32 %v1143_v7, %v2355_v29  ;;  %v998_v25 = vpop.permute.xlu1 %997  ;;  %v1009_v33 = vmul.f32 %v1000_v45, %v2325_v31  ;;  %v2508_v31 = vpop.f32.mrf.mxu1 }
 0x476   :  { %v1011_v5 = vmul.f32 %v2372_v55, %v998_v25  ;;  %v1001_v35 = vsel %vm133_vm9, %v996_v56, %v998_v25 }
 0x477   :  { %v1010_v9 = vmul.f32 %v1001_v35, %v2355_v29 }
 0x479   :  { %1475 = vrot.lane.b32.xlu0 %v1465_v23, %s1779_s0  ;;  %1017 = vrot.lane.b32.xlu1 %v1007_v52, %s1781_s15 }
 0x47d   :  { %1483 = vrot.lane.b32.xlu0 %v1469_v20, %s1779_s0  ;;  %1477 = vrot.lane.b32.xlu1 %v1466_v49, %s1779_s0 }
 0x481   :  { %1404 = vrot.lane.b32.xlu0 %v1394_v53, %s1785_s21  ;;  %1335 = vrot.lane.b32.xlu1 %v1324_v54, %s1780_s12 }
 0x485   :  { %1341 = vrot.lane.b32.xlu0 %v1327_v21, %s1780_s12  ;;  %1406 = vrot.lane.b32.xlu1 %v1395_v3, %s1785_s21 }
 0x489   :  { %1412 = vrot.lane.b32.xlu0 %v1398_v15, %s1785_s21  ;;  %1481 = vrot.lane.b32.xlu1 %v1468_v59, %s1779_s0 }
 0x48d   :  { %1262 = vrot.lane.b32.xlu0 %v1252_v57, %s1784_s18  ;;  %1264 = vrot.lane.b32.xlu1 %v1253_v60, %s1784_s18 }
 0x491   :  { %1270 = vrot.lane.b32.xlu0 %v1256_v61, %s1784_s18  ;;  %1339 = vrot.lane.b32.xlu1 %v1326_v63, %s1780_s12 }
 0x495   :  { %1159 = vrot.lane.b32.xlu0 %v1149_v62, %s1782_s16  ;;  %1410 = vrot.lane.b32.xlu1 %v1397_v13, %s1785_s21 }
 0x499   :  { %1096 = vrot.lane.b32.xlu0 %v1082_v22, %s1783_s17  ;;  %1090 = vrot.lane.b32.xlu1 %v1079_v24, %s1783_s17 }
 0x49d   :  { %1167 = vrot.lane.b32.xlu0 %v1153_v14, %s1782_s16  ;;  %1161 = vrot.lane.b32.xlu1 %v1150_v18, %s1782_s16 }
 0x4a1   :  { %1479 = vrot.lane.b32.xlu0 %v1467_v11, %s1779_s0  ;;  %1268 = vrot.lane.b32.xlu1 %v1255_v28, %s1784_s18 }
 0x4a5   :  { %1337 = vrot.lane.b32.xlu0 %v1325_v19, %s1780_s12  ;;  %1019 = vrot.lane.b32.xlu1 %v1008_v8, %s1781_s15 }
 0x4a9   :  { %1408 = vrot.lane.b32.xlu0 %v2340_v30, %s1785_s21  ;;  %1094 = vrot.lane.b32.xlu1 %v1081_v40, %s1783_s17  ;;  %v2499_v30 = vpop.f32.mrf.mxu0 }
 0x4ad   :  { %1266 = vrot.lane.b32.xlu0 %v2343_v0, %s1784_s18  ;;  %1165 = vrot.lane.b32.xlu1 %v1152_v50, %s1782_s16  ;;  %v2501_v0 = vpop.f32.mrf.mxu0 }
 0x4b1   :  { %1092 = vrot.lane.b32.xlu0 %v2346_v12, %s1783_s17  ;;  %1025 = vrot.lane.b32.xlu1 %v1011_v5, %s1781_s15  ;;  %v821_v12 = vadd.f32 %v2501_v0, %v2499_v30 }
 0x4b3   :  { %v822_v16 = vadd.f32 %v821_v12, %v2503_v36 }
 0x4b5   :  { %1163 = vrot.lane.b32.xlu0 %v2349_v26, %s1782_s16  ;;  %v823_v55 = vadd.f32 %v822_v16, %v2508_v31 }
 0x4b9   :  { %1021 = vrot.lane.b32.xlu0 %v1009_v33, %s1781_s15 }
 0x4bd   :  { %1023 = vrot.lane.b32.xlu0 %v1010_v9, %s1781_s15 }
 0x4d7   :  { %v1192_v26 = vpop.permute.xlu1 %1191 }
 0x4db   :  { %v1194_v1 = vpop.permute.xlu1 %1193 }
 0x4dc   :  { %v2512_v29 = vsel %vm353_vm11, %v1192_v26, %v1194_v1  ;;  %824 = vadd.xlane.f32.xlu0 %v823_v55 }
 0x4dd   :  { %1209 = vst [vmem:[#allocation3 + $0x20] sm:$0xff] %v2512_v29 }
 0x4df   :  { %v1198_v44 = vpop.permute.xlu1 %1197 }
 0x4e3   :  { %v1200_v46 = vpop.permute.xlu0 %1199  ;;  %v1334_v52 = vpop.permute.xlu1 %1333 }
 0x4e4   :  { %v2516_v23 = vsel %vm353_vm11, %v1198_v44, %v1200_v46 }
 0x4e5   :  { %1212 = vst [vmem:[#allocation3 + $0xa0] sm:$0xff] %v2516_v23 }
 0x4e7   :  { %v1196_v38 = vpop.permute.xlu0 %1195  ;;  %v1089_v51 = vpop.permute.xlu1 %1088 }
 0x4e8   :  { %v2520_v20 = vsel %vm353_vm11, %v1194_v1, %v1196_v38  ;;  %v2523_v49 = vsel %vm353_vm11, %v1196_v38, %v1198_v44 }
 0x4e9   :  { %1210 = vst [vmem:[#allocation3 + $0xc8] sm:$0xff] %v2520_v20  ;;  %1211 = vst [vmem:[#allocation3 + $0x90] sm:$0xff] %v2523_v49 }
 0x4eb   :  { %v1476_v53 = vpop.permute.xlu0 %1475  ;;  %v1018_v54 = vpop.permute.xlu1 %1017 }
 0x4ef   :  { %v1484_v47 = vpop.permute.xlu0 %1483  ;;  %v1478_v21 = vpop.permute.xlu1 %1477 }
 0x4f0   :  { %v1485_v3 = vsel %vm2626_vm0, %v1476_v53, %v1478_v21 }
 0x4f1   :  { %v1549_v8 = vpack.c.bf16 %v1485_v3, %v1485_v3 }
 0x4f3   :  { %v1405_v48 = vpop.permute.xlu0 %1404  ;;  %v1336_v15 = vpop.permute.xlu1 %1335  ;;  %v1559_v33 = vsel %vm1557_vm5, %v1549_v8, 0 }
 0x4f4   :  { %v2529_v59 = vsel %vm506_vm13, %v1334_v52, %v1336_v15 }
 0x4f7   :  { %v1342_v39 = vpop.permute.xlu0 %1341  ;;  %v1407_v57 = vpop.permute.xlu1 %1406 }
 0x4f8   :  { %v1414_v60 = vsel %vm585_vm2, %v1405_v48, %v1407_v57 }
 0x4fb   :  { %v1413_v32 = vpop.permute.xlu0 %1412  ;;  %v1482_v61 = vpop.permute.xlu1 %1481 }
 0x4fc   :  { %v1488_v63 = vsel %vm2627_vm4, %v1482_v61, %v1484_v47  ;;  %v1545_v47 = vpack.c.bf16 %v1414_v60, %v2529_v59 }
 0x4fd   :  { %v1552_v58 = vpack.c.bf16 %v1488_v63, %v1488_v63 }
 0x4ff   :  { %v1263_v62 = vpop.permute.xlu0 %1262  ;;  %v1265_v13 = vpop.permute.xlu1 %1264  ;;  %1736 = vmatprep.subr.msk.bf16.mxu1 %vm1557_vm5, %v1552_v58 }
 0x500   :  { %v2535_v56 = vsel %vm432_vm1, %v1263_v62, %v1265_v13 }
 0x503   :  { %v1271_v2 = vpop.permute.xlu0 %1270  ;;  %v1340_v17 = vpop.permute.xlu1 %1339 }
 0x504   :  { %v1346_v22 = vsel %vm506_vm13, %v1340_v17, %v1342_v39 }
 0x507   :  { %v1160_v24 = vpop.permute.xlu0 %1159  ;;  %v1411_v34 = vpop.permute.xlu1 %1410 }
 0x508   :  { %v1417_v10 = vsel %vm585_vm2, %v1411_v34, %v1413_v32 }
 0x509   :  { %v1548_v9 = vpack.c.bf16 %v1417_v10, %v1346_v22 }
 0x50b   :  { %v1097_v14 = vpop.permute.xlu0 %1096  ;;  %v1091_v18 = vpop.permute.xlu1 %1090 }
 0x50c   :  { %v2540_v4 = vsel %vm241_vm14, %v1089_v51, %v1091_v18 }
 0x50d   :  { %1106 = vst [vmem:[#allocation3 + $0x80] sm:$0xff] %v2540_v4 }
 0x50f   :  { %v1168_v11 = vpop.permute.xlu0 %1167  ;;  %v1162_v28 = vpop.permute.xlu1 %1161 }
 0x510   :  { %v2544_v6 = vsel %vm320_vm12, %v1160_v24, %v1162_v28 }
 0x511   :  { %1177 = vst [vmem:[#allocation3 + $0xf8] sm:$0xff] %v2544_v6 }
 0x513   :  { %v1480_v19 = vpop.permute.xlu0 %1479  ;;  %v1269_v7 = vpop.permute.xlu1 %1268 }
 0x514   :  { %v1486_v37 = vsel %vm2628_vm6, %v1478_v21, %v1480_v19  ;;  %v1487_v40 = vsel %vm2629_vm7, %v1480_v19, %v1482_v61  ;;  %v1275_v50 = vsel %vm432_vm1, %v1269_v7, %v1271_v2 }
 0x515   :  { %v1550_v25 = vpack.c.bf16 %v1486_v37, %v1486_v37  ;;  %v1551_v5 = vpack.c.bf16 %v1487_v40, %v1487_v40  ;;  %v1544_v21 = vpack.c.bf16 %v1275_v50, %v2516_v23  ;;  %v1541_v23 = vpack.c.bf16 %v2535_v56, %v2512_v29 }
 0x517   :  { %v1338_v45 = vpop.permute.xlu0 %1337  ;;  %1734 = vmatprep.subr.msk.bf16.mxu0 %vm1557_vm5, %v1550_v25  ;;  %v1565_v35 = vsel %vm1557_vm5, %v1551_v5, 0  ;;  %v1020_v26 = vpop.permute.xlu1 %1019 }
 0x518   :  { %v1344_v12 = vsel %vm506_vm13, %v1336_v15, %v1338_v45  ;;  %v1345_v16 = vsel %vm506_vm13, %v1338_v45, %v1340_v17  ;;  %1577 = vmatpush1.bf16.msra.mxu0 %v1559_v33  ;;  %1618 = vmatpush1.bf16.msra.mxu1 %v1565_v35  ;;  %v1027_v55 = vsel %vm167_vm3, %v1018_v54, %v1020_v26 }
 0x519   :  { %1619 = vmatprep.subr.bf16.mxu1 %v1548_v9  ;;  %1035 = vst [vmem:[#allocation3 + $0x108] sm:$0xff] %v1027_v55  ;;  %v1533_v22 = vpack.c.bf16 %v1027_v55, %v2352_v41 }
 0x51b   :  { %v1409_v1 = vpop.permute.xlu0 %1408  ;;  %v1095_v52 = vpop.permute.xlu1 %1094 }
 0x51c   :  { %v1415_v44 = vsel %vm585_vm2, %v1407_v57, %v1409_v1  ;;  %v1416_v46 = vsel %vm585_vm2, %v1409_v1, %v1411_v34  ;;  %v1101_v38 = vsel %vm241_vm14, %v1095_v52, %v1097_v14 }
 0x51d   :  { %v1546_v51 = vpack.c.bf16 %v1415_v44, %v1344_v12  ;;  %v1547_v53 = vpack.c.bf16 %v1416_v46, %v1345_v16  ;;  %1109 = vst [vmem:[#allocation3 + $0x98] sm:$0xff] %v1101_v38 }
 0x51f   :  { %v1267_v3 = vpop.permute.xlu0 %1266  ;;  %1578 = vmatprep.subr.bf16.mxu0 %v1546_v51  ;;  %1620 = vmatpush1.bf16.msra.mxu1 %v1547_v53  ;;  %v1166_v15 = vpop.permute.xlu1 %1165  ;;  %v813_v51 = vld [vmem:[%s2619_s3 + $0x8] sm:$0xff] }
 0x520   :  { %v1273_v54 = vsel %vm432_vm1, %v1265_v13, %v1267_v3  ;;  %v1274_v48 = vsel %vm432_vm1, %v1267_v3, %v1269_v7  ;;  %1579 = vmatpush1.bf16.msra.mxu0 %v1545_v47  ;;  %1621 = vmatprep.subr.bf16.mxu1 %v1544_v21  ;;  %v1172_v39 = vsel %vm320_vm12, %v1166_v15, %v1168_v11  ;;  %v815_v21 = vld [vmem:[%s2620_s4 + $0x8] sm:$0xff] }
 0x521   :  { %v1542_v57 = vpack.c.bf16 %v1273_v54, %v2520_v20  ;;  %v1543_v32 = vpack.c.bf16 %v1274_v48, %v2523_v49  ;;  %1180 = vst [vmem:[#allocation3 + $0x78] sm:$0xff] %v1172_v39  ;;  %v1540_v59 = vpack.c.bf16 %v1172_v39, %v1101_v38  ;;  %v1537_v13 = vpack.c.bf16 %v2544_v6, %v2540_v4 }
 0x523   :  { %v1093_v60 = vpop.permute.xlu0 %1092  ;;  %1580 = vmatprep.subr.bf16.mxu0 %v1542_v57  ;;  %1622 = vmatpush1.bf16.msra.mxu1 %v1543_v32  ;;  %v1026_v24 = vpop.permute.xlu1 %1025 }
 0x524   :  { %v1099_v61 = vsel %vm241_vm14, %v1091_v18, %v1093_v60  ;;  %v1100_v63 = vsel %vm241_vm14, %v1093_v60, %v1095_v52  ;;  %1581 = vmatpush1.bf16.msra.mxu0 %v1541_v23  ;;  %1623 = vmatprep.subr.bf16.mxu1 %v1540_v59  ;;  %v933_v18 = vld [vmem:[%s2621_s5] sm:$0xf] }
 0x525   :  { %1107 = vst [vmem:[#allocation3 + $0x110] sm:$0xff] %v1099_v61  ;;  %1108 = vst [vmem:[#allocation3 + $0x118] sm:$0xff] %v1100_v63 }
 0x527   :  { %v1164_v58 = vpop.permute.xlu0 %1163 }
 0x528   :  { %v1170_v20 = vsel %vm320_vm12, %v1162_v28, %v1164_v58  ;;  %v1171_v49 = vsel %vm320_vm12, %v1164_v58, %v1166_v15 }
 0x529   :  { %1178 = vst [vmem:[#allocation3 + $0x38] sm:$0xff] %v1170_v20  ;;  %1179 = vst [vmem:[#allocation3 + $0x8] sm:$0xff] %v1171_v49  ;;  %v1538_v29 = vpack.c.bf16 %v1170_v20, %v1099_v61  ;;  %v1539_v62 = vpack.c.bf16 %v1171_v49, %v1100_v63 }
 0x52b   :  { %v1022_v56 = vpop.permute.xlu0 %1021  ;;  %1582 = vmatprep.subr.bf16.mxu0 %v1538_v29  ;;  %1624 = vmatpush1.bf16.msra.mxu1 %v1539_v62 }
 0x52c   :  { %v1028_v2 = vsel %vm167_vm3, %v1020_v26, %v1022_v56  ;;  %1583 = vmatpush1.bf16.msra.mxu0 %v1537_v13 }
 0x52d   :  { %1036 = vst [vmem:[#allocation3 + $0x68] sm:$0xff] %v1028_v2  ;;  %v1534_v17 = vpack.c.bf16 %v1028_v2, %v2317_v27 }
 0x52f   :  { %v1024_v34 = vpop.permute.xlu0 %1023  ;;  %1584 = vmatprep.subr.bf16.mxu0 %v1534_v17 }
 0x530   :  { %v1029_v10 = vsel %vm167_vm3, %v1022_v56, %v1024_v34  ;;  %v1030_v14 = vsel %vm167_vm3, %v1024_v34, %v1026_v24  ;;  %1585 = vmatpush1.bf16.msra.mxu0 %v1533_v22  ;;  %v1652_v56 = vld [vmem:[%s2622_s6] sm:$0xff] }
 0x531   :  { %1037 = vst [vmem:[#allocation3 + $0x30] sm:$0xff] %v1029_v10  ;;  %1038 = vst [vmem:[#allocation3 + $0x18] sm:$0xff] %v1030_v14  ;;  %v1536_v4 = vpack.c.bf16 %v1030_v14, %v2366_v43  ;;  %v1535_v27 = vpack.c.bf16 %v1029_v10, %v2361_v42  ;;  %v1653_v22 = vld [vmem:[%s2623_s7] sm:$0xff] }
 0x533   :  { %1735 = vmatmul.mubr.msk.bf16.vlgmr.msra.gmra.mxu0 %vm1553_vm8, %v933_v18  ;;  %1625 = vmatprep.subr.bf16.mxu1 %v1536_v4 }
 0x534   :  { %1626 = vmatpush1.bf16.msra.mxu1 %v1535_v27 }
 0x537   :  { %1737 = vmatmul.mubr.msk.bf16.vlgmr.msra.gmra.mxu1 %vm1553_vm8, %v933_v18 }
 0x565   :  { %v825_v41 = vpop.xlane.xlu0 %824 }
 0x566   :  { %v828_v11 = vmul.f32 0.001953125, %v825_v41 }
 0x568   :  { %v833_v28 = vsub.f32 %v2499_v30, %v828_v11  ;;  %v834_v6 = vsub.f32 %v2501_v0, %v828_v11  ;;  %v835_v19 = vsub.f32 %v2503_v36, %v828_v11  ;;  %v836_v8 = vsub.f32 %v2508_v31, %v828_v11 }
 0x56a   :  { %v841_v37 = vmul.f32 %v833_v28, %v833_v28  ;;  %v842_v40 = vmul.f32 %v834_v6, %v834_v6  ;;  %v843_v7 = vmul.f32 %v835_v19, %v835_v19  ;;  %v844_v50 = vmul.f32 %v836_v8, %v836_v8 }
 0x56c   :  { %v850_v43 = vadd.f32 %v842_v40, %v841_v37 }
 0x56e   :  { %v851_v42 = vadd.f32 %v850_v43, %v843_v7 }
 0x570   :  { %v852_v25 = vadd.f32 %v851_v42, %v844_v50 }
 0x572   :  { %853 = vadd.xlane.f32.xlu0 %v852_v25 }
 0x5f3   :  { %v1604_v5 = vpop.f32.mrf.mxu0 }
 0x5f5   :  { %v1606_v45 = vpop.f32.mrf.mxu0 }
 0x5f6   :  { %v1654_v33 = vadd.f32 %v1606_v45, %v1604_v5 }
 0x5f7   :  { %v1608_v35 = vpop.f32.mrf.mxu0  ;;  %v1645_v9 = vpop.f32.mrf.mxu1 }
 0x5f8   :  { %v1655_v12 = vadd.f32 %v1654_v33, %v1645_v9 }
 0x5f9   :  { %v1609_v16 = vpop.f32.mrf.mxu0  ;;  %v1647_v26 = vpop.f32.mrf.mxu1 }
 0x5fa   :  { %v1656_v55 = vadd.f32 %v1655_v12, %v1647_v26 }
 0x5fb   :  { %v854_v1 = vpop.xlane.xlu0 %853  ;;  %v1649_v44 = vpop.f32.mrf.mxu1 }
 0x5fc   :  { %v856_v46 = vmul.f32 0.001953125, %v854_v1  ;;  %1657 = vadd.xlane.f32.xlu1 %v1656_v55 }
 0x5fd   :  { %v1650_v52 = vpop.f32.mrf.mxu1 }
 0x5fe   :  { %v858_v38 = vadd.f32 1e-05, %v856_v46 }
 0x600   :  { %1765 = vrsqrt.f32 %v858_v38 }
 0x60d   :  { %v1766_v53 = vpop.eup %1765 }
 0x60e   :  { %v862_v47 = vmul.f32 %v1766_v53, %v813_v51 }
 0x610   :  { %870 = vperm.xlu1 %1759, %v862_v47   ;;  %v882_v3 = vmul.f32 %v862_v47, %v828_v11 }
 0x612   :  { %v884_v54 = vsub.f32 %v815_v21, %v882_v3 }
 0x614   :  { %892 = vperm.xlu1 %1759, %v884_v54  }
 0x685   :  { %v1658_v48 = vpop.xlane.xlu1 %1657 }
 0x686   :  { %v1659_v15 = vmul.f32 0.001953125, %v1658_v48 }
 0x688   :  { %v1660_v39 = vsub.f32 %v1604_v5, %v1659_v15  ;;  %v1661_v57 = vsub.f32 %v1606_v45, %v1659_v15  ;;  %v1662_v32 = vsub.f32 %v1645_v9, %v1659_v15  ;;  %v1663_v60 = vsub.f32 %v1647_v26, %v1659_v15 }
 0x68a   :  { %v1664_v23 = vmul.f32 %v1660_v39, %v1660_v39  ;;  %v1665_v59 = vmul.f32 %v1661_v57, %v1661_v57  ;;  %v1666_v61 = vmul.f32 %v1662_v32, %v1662_v32  ;;  %v1667_v58 = vmul.f32 %v1663_v60, %v1663_v60 }
 0x68b   :  { %v871_v10 = vpop.permute.xlu1 %870 }
 0x68c   :  { %v1668_v63 = vadd.f32 %v1665_v59, %v1664_v23  ;;  %v877_v4 = vmul.f32 %v871_v10, %v2499_v30  ;;  %v878_v27 = vmul.f32 %v871_v10, %v2501_v0  ;;  %v879_v41 = vmul.f32 %v871_v10, %v2503_v36 }
 0x68d   :  { %v880_v11 = vmul.f32 %v871_v10, %v2508_v31 }
 0x68e   :  { %v1669_v20 = vadd.f32 %v1668_v63, %v1666_v61 }
 0x68f   :  { %v893_v14 = vpop.permute.xlu1 %892 }
 0x690   :  { %v1670_v49 = vadd.f32 %v1669_v20, %v1667_v58  ;;  %v899_v37 = vadd.f32 %v893_v14, %v877_v4  ;;  %v900_v40 = vadd.f32 %v893_v14, %v878_v27  ;;  %v901_v7 = vadd.f32 %v893_v14, %v879_v41 }
 0x691   :  { %v902_v43 = vadd.f32 %v893_v14, %v880_v11 }
 0x692   :  { %1671 = vadd.xlane.f32.xlu0 %v1670_v49 }
 0x71b   :  { %v1672_v29 = vpop.xlane.xlu0 %1671 }
 0x71c   :  { %v1673_v62 = vmul.f32 0.001953125, %v1672_v29 }
 0x71e   :  { %v1674_v13 = vadd.f32 1e-05, %v1673_v62 }
 0x720   :  { %1767 = vrsqrt.f32 %v1674_v13 }
 0x72d   :  { %v1768_v2 = vpop.eup %1767 }
 0x72e   :  { %v1676_v17 = vmul.f32 %v1768_v2, %v1652_v56 }
 0x730   :  { %1679 = vperm.xlu0 %1758, %v1676_v17   ;;  %v1686_v24 = vmul.f32 %v1676_v17, %v1659_v15 }
 0x732   :  { %v1687_v34 = vsub.f32 %v1653_v22, %v1686_v24 }
 0x734   :  { %1690 = vperm.xlu1 %1759, %v1687_v34  }
 0x7ab   :  { %v1680_v18 = vpop.permute.xlu0 %1679 }
 0x7ac   :  { %v1682_v28 = vmul.f32 %v1680_v18, %v1604_v5  ;;  %v1683_v6 = vmul.f32 %v1680_v18, %v1606_v45  ;;  %v1684_v19 = vmul.f32 %v1680_v18, %v1645_v9  ;;  %v1685_v8 = vmul.f32 %v1680_v18, %v1647_v26 }
 0x7af   :  { %v1691_v50 = vpop.permute.xlu1 %1690 }
 0x7b0   :  { %v1693_v42 = vadd.f32 %v1691_v50, %v1682_v28  ;;  %v1694_v25 = vadd.f32 %v1691_v50, %v1683_v6  ;;  %v1695_v33 = vadd.f32 %v1691_v50, %v1684_v19  ;;  %v1696_v35 = vadd.f32 %v1691_v50, %v1685_v8 }
 0x7b2   :  { %v1697_v30 = vadd.f32 %v1693_v42, %v899_v37  ;;  %v1698_v12 = vadd.f32 %v1694_v25, %v900_v40  ;;  %v1699_v0 = vadd.f32 %v1695_v33, %v901_v7  ;;  %v1700_v16 = vadd.f32 %v1696_v35, %v902_v43 }
 0x7b4   :  { %v1701_v36 = vmax.f32 %v1697_v30, 0.0  ;;  %v1702_v55 = vmax.f32 %v1698_v12, 0.0  ;;  %v1703_v31 = vmax.f32 %v1699_v0, 0.0  ;;  %v1704_v5 = vmax.f32 %v1700_v16, 0.0 }
 0x7b6   :  { %1705 = vst [vmem:[%s2624_s8] sm:$0xff] %v1701_v36  ;;  %1706 = vst [vmem:[%s2624_s8 + $0x8] sm:$0xff] %v1702_v55 }
 0x7b7   :  { %1738 = vst [vmem:[%s2624_s8 + $0x10] sm:$0xff] %v1703_v31  ;;  %1739 = vst [vmem:[%s2624_s8 + $0x18] sm:$0xff] %v1704_v5 }

</bundles_post_ra>
